<compile_context>
chip_gen: v7x
topology: tpu7x:2x2x1
jax: 0.10.0
libtpu: 0.0.40
codegen_flags: <defaults>
</compile_context>

<pallas_src>
import jax
import jax.numpy as jnp
from jax.experimental import pallas as pl

# ---- synthetic encoder config (small shapes) ---------------------------------
VOCAB = 64        # len_tokenizer
B = 2             # batch
S = 8             # sequence length
H = 32            # hidden size
NH = 2            # attention heads
HD = H // NH      # head dim
FF = 64           # feed-forward dim
NLAYERS = 2
LN_EPS = 1e-5

NB = 2 * B        # stacked (left, right) x batch sequences
T = NB * S        # total tokens processed by the fused kernel


# ---- in-kernel helper ---------------------------------------------------------
def _layernorm(x, gamma, beta, eps=LN_EPS):
    mu = jnp.mean(x, axis=-1, keepdims=True)
    var = jnp.mean((x - mu) ** 2, axis=-1, keepdims=True)
    return (x - mu) * jax.lax.rsqrt(var + eps) * gamma + beta


# ---- single fused kernel: embed+LN -> encoder layers -> pool + L2 norm --------
def fused_forward_kernel(word_ref, pos_ref, bias_ref, pool_ref,
                         eg_ref, eb_ref,
                         wqkv_ref, bqkv_ref, wo_ref, bo_ref, ln1_ref,
                         w1_ref, b1_ref, w2_ref, b2_ref, ln2_ref,
                         o_ref):
    # ---- embeddings + LayerNorm ----------------------------------------------
    x = _layernorm(word_ref[...] + pos_ref[...], eg_ref[...], eb_ref[...])   # (T, H)

    # additive attention bias (block-diagonal + key padding), precomputed in wrapper
    bias = bias_ref[...]                                              # (T, T)
    scale = 1.0 / float(HD) ** 0.5

    # ---- transformer encoder layers (static unroll; weights VMEM resident) ---
    for l in range(NLAYERS):
        qkv = jnp.dot(x, wqkv_ref[l], preferred_element_type=jnp.float32) + bqkv_ref[l]
        ctx_parts = []
        for h in range(NH):
            lo = h * HD
            qh = qkv[:, lo:lo + HD] * scale
            kh = qkv[:, H + lo:H + lo + HD]
            vh = qkv[:, 2 * H + lo:2 * H + lo + HD]
            # scores = qh @ kh^T over the whole slab; bias isolates sequences
            s = jax.lax.dot_general(qh, kh, (((1,), (1,)), ((), ())),
                                    preferred_element_type=jnp.float32) + bias
            m = jnp.max(s, axis=-1, keepdims=True)
            p = jnp.exp(s - m)
            p = p * pl.reciprocal(jnp.sum(p, axis=-1, keepdims=True), approx=True)
            ctx_parts.append(jnp.dot(p, vh, preferred_element_type=jnp.float32))
        ctx = jnp.concatenate(ctx_parts, axis=1)                       # (T, H)
        attn = jnp.dot(ctx, wo_ref[l], preferred_element_type=jnp.float32) + bo_ref[l]

        ln1 = ln1_ref[l]                                               # (2, H)
        x = _layernorm(x + attn, ln1[0:1, :], ln1[1:2, :])

        hmid = jnp.dot(x, w1_ref[l], preferred_element_type=jnp.float32) + b1_ref[l]
        # TODO(synk): roberta-base uses exact (erf) GELU; tanh approximation used here.
        hmid = jax.nn.gelu(hmid, approximate=True)
        ffn = jnp.dot(hmid, w2_ref[l], preferred_element_type=jnp.float32) + b2_ref[l]

        ln2 = ln2_ref[l]
        x = _layernorm(x + ffn, ln2[0:1, :], ln2[1:2, :])

    # ---- masked mean pooling: one MXU dot with precomputed pooling matrix -----
    pooled = jnp.dot(pool_ref[...], x, preferred_element_type=jnp.float32)  # (NB, H)

    # ---- F.normalize(dim=-1): single EUP rsqrt ---------------------------------
    sumsq = jnp.sum(pooled * pooled, axis=-1, keepdims=True)
    pooled = pooled * jax.lax.rsqrt(jnp.maximum(sumsq, 1e-24))

    # output layout (NB, H): rows 0..B-1 = left, rows B..NB-1 = right
    o_ref[...] = pooled


# ---- parameter init (deterministic, synthetic) --------------------------------
def init_params(key):
    std = 0.02
    k = jax.random.split(key, 6)

    def nrm(kk, shape):
        return std * jax.random.normal(kk, shape, jnp.float32)

    ln_init = jnp.stack([jnp.ones((NLAYERS, H), jnp.float32),
                         jnp.zeros((NLAYERS, H), jnp.float32)], axis=1)   # (L, 2, H)
    return {
        "word_emb": nrm(k[0], (VOCAB, H)),
        # TODO(synk): RoBERTa offsets position ids by padding_idx+1 and adds
        # token-type embeddings; the synthetic encoder uses positions 0..S-1 only.
        "pos_emb": nrm(k[1], (S, H)),
        "emb_ln_g": jnp.ones((1, H), jnp.float32),
        "emb_ln_b": jnp.zeros((1, H), jnp.float32),
        "wqkv": nrm(k[2], (NLAYERS, H, 3 * H)),
        "bqkv": jnp.zeros((NLAYERS, 1, 3 * H), jnp.float32),
        "wo": nrm(k[3], (NLAYERS, H, H)),
        "bo": jnp.zeros((NLAYERS, 1, H), jnp.float32),
        "ln1": ln_init,
        "w1": nrm(k[4], (NLAYERS, H, FF)),
        "b1": jnp.zeros((NLAYERS, 1, FF), jnp.float32),
        "w2": nrm(k[5], (NLAYERS, FF, H)),
        "b2": jnp.zeros((NLAYERS, 1, H), jnp.float32),
        "ln2": ln_init,
    }


# ---- full forward (mirrors BarlowTwinsPretrainModel.forward) -------------------
@jax.jit
def barlow_twins_forward(params, ids_left, ids_right, mask_left, mask_right):
    # glue in plain JAX: stacking, data-dependent embedding gather, mask -> bias/pool
    ids_all = jnp.concatenate([ids_left, ids_right], axis=0)                   # (NB, S)
    mask_all = jnp.concatenate([mask_left, mask_right], axis=0).astype(jnp.float32)
    word = jnp.take(params["word_emb"], ids_all, axis=0).reshape(T, H)         # (T, H)
    pos_rep = jnp.tile(params["pos_emb"], (NB, 1))                             # (T, H)

    # block-diagonal additive attention bias with key padding (T, T)
    mask_flat = mask_all.reshape(T)
    seg = jnp.arange(T, dtype=jnp.int32) // S
    same_seq = seg[:, None] == seg[None, :]
    key_ok = mask_flat[None, :] > 0.5
    bias = jnp.where(same_seq & key_ok, 0.0, -1e9).astype(jnp.float32)         # (T, T)

    # masked-mean pooling matrix (NB, T): block-diagonal mask / token count
    counts = jnp.maximum(jnp.sum(mask_all, axis=1), 1e-9)                      # (NB,)
    seq_onehot = (seg[None, :] == jnp.arange(NB, dtype=jnp.int32)[:, None]).astype(jnp.float32)
    pool = seq_onehot * mask_flat[None, :] / counts[:, None]                   # (NB, T)

    out = pl.pallas_call(
        fused_forward_kernel,
        out_shape=jax.ShapeDtypeStruct((NB, H), jnp.float32),
    )(word, pos_rep, bias, pool,
      params["emb_ln_g"], params["emb_ln_b"],
      params["wqkv"], params["bqkv"], params["wo"], params["bo"], params["ln1"],
      params["w1"], params["b1"], params["w2"], params["b2"], params["ln2"])

    # (NB, H) -> (B, 2, H): matches torch.cat((left.unsqueeze(1), right.unsqueeze(1)), 1)
    return jnp.stack([out[:B], out[B:]], axis=1)


if __name__ == "__main__":
    key = jax.random.PRNGKey(0)
    k_params, k_il, k_ir = jax.random.split(key, 3)

    params = init_params(k_params)

    input_ids_left = jax.random.randint(k_il, (B, S), 0, VOCAB, dtype=jnp.int32)
    input_ids_right = jax.random.randint(k_ir, (B, S), 0, VOCAB, dtype=jnp.int32)
    attention_mask_left = jnp.array(
        [[1, 1, 1, 1, 1, 1, 1, 1],
         [1, 1, 1, 1, 1, 0, 0, 0]], dtype=jnp.int32)
    attention_mask_right = jnp.array(
        [[1, 1, 1, 1, 1, 1, 0, 0],
         [1, 1, 1, 0, 0, 0, 0, 0]], dtype=jnp.int32)

    out = barlow_twins_forward(params, input_ids_left, input_ids_right,
                               attention_mask_left, attention_mask_right)
    out = jax.block_until_ready(out)
    assert out.shape == (B, 2, H) and out.dtype == jnp.float32
    assert bool(jnp.all(jnp.isfinite(out)))
    print("KERNEL_OK")
</pallas_src>

<mosaic_0001>
module attributes {stable_mosaic.version = 11 : i64} {
  func.func @fused_forward_kernel(%arg0: memref<32x32xf32, #tpu.memory_space<vmem>>, %arg1: memref<32x32xf32, #tpu.memory_space<vmem>>, %arg2: memref<32x32xf32, #tpu.memory_space<vmem>>, %arg3: memref<4x32xf32, #tpu.memory_space<vmem>>, %arg4: memref<1x32xf32, #tpu.memory_space<vmem>>, %arg5: memref<1x32xf32, #tpu.memory_space<vmem>>, %arg6: memref<2x32x96xf32, #tpu.memory_space<vmem>>, %arg7: memref<2x1x96xf32, #tpu.memory_space<vmem>>, %arg8: memref<2x32x32xf32, #tpu.memory_space<vmem>>, %arg9: memref<2x1x32xf32, #tpu.memory_space<vmem>>, %arg10: memref<2x2x32xf32, #tpu.memory_space<vmem>>, %arg11: memref<2x32x64xf32, #tpu.memory_space<vmem>>, %arg12: memref<2x1x64xf32, #tpu.memory_space<vmem>>, %arg13: memref<2x64x32xf32, #tpu.memory_space<vmem>>, %arg14: memref<2x1x32xf32, #tpu.memory_space<vmem>>, %arg15: memref<2x2x32xf32, #tpu.memory_space<vmem>>, %arg16: memref<4x32xf32, #tpu.memory_space<vmem>>) attributes {dimension_semantics = [], scalar_prefetch = 0 : i64, scratch_operands = 0 : i64, tpu.core_type = #tpu.core_type<tc>} {
    %c0 = arith.constant 0 : index
    %c0_0 = arith.constant 0 : index
    %0 = vector.load %arg0[%c0, %c0_0] : memref<32x32xf32, #tpu.memory_space<vmem>>, vector<32x32xf32>
    %c0_1 = arith.constant 0 : index
    %c0_2 = arith.constant 0 : index
    %1 = vector.load %arg1[%c0_1, %c0_2] : memref<32x32xf32, #tpu.memory_space<vmem>>, vector<32x32xf32>
    %2 = arith.addf %0, %1 : vector<32x32xf32>
    %c0_3 = arith.constant 0 : index
    %c0_4 = arith.constant 0 : index
    %3 = vector.load %arg4[%c0_3, %c0_4] : memref<1x32xf32, #tpu.memory_space<vmem>>, vector<1x32xf32>
    %c0_5 = arith.constant 0 : index
    %c0_6 = arith.constant 0 : index
    %4 = vector.load %arg5[%c0_5, %c0_6] : memref<1x32xf32, #tpu.memory_space<vmem>>, vector<1x32xf32>
    %cst = arith.constant dense<0.000000e+00> : vector<32xf32>
    %5 = vector.multi_reduction <add>, %2, %cst [1] : vector<32x32xf32> to vector<32xf32>
    %6 = vector.shape_cast %5 : vector<32xf32> to vector<32x1xf32>
    %cst_7 = arith.constant 3.200000e+01 : f32
    %7 = vector.broadcast %cst_7 : f32 to vector<32x1xf32>
    %8 = arith.divf %6, %7 : vector<32x1xf32>
    %9 = vector.broadcast %8 : vector<32x1xf32> to vector<32x32xf32>
    %10 = arith.subf %2, %9 : vector<32x32xf32>
    %11 = arith.mulf %10, %10 : vector<32x32xf32>
    %cst_8 = arith.constant dense<0.000000e+00> : vector<32xf32>
    %12 = vector.multi_reduction <add>, %11, %cst_8 [1] : vector<32x32xf32> to vector<32xf32>
    %13 = vector.shape_cast %12 : vector<32xf32> to vector<32x1xf32>
    %cst_9 = arith.constant 3.200000e+01 : f32
    %14 = vector.broadcast %cst_9 : f32 to vector<32x1xf32>
    %15 = arith.divf %13, %14 : vector<32x1xf32>
    %16 = vector.broadcast %8 : vector<32x1xf32> to vector<32x32xf32>
    %17 = arith.subf %2, %16 : vector<32x32xf32>
    %cst_10 = arith.constant 9.99999974E-6 : f32
    %18 = vector.broadcast %cst_10 : f32 to vector<32x1xf32>
    %19 = arith.addf %15, %18 : vector<32x1xf32>
    %20 = math.rsqrt %19 : vector<32x1xf32>
    %21 = vector.broadcast %20 : vector<32x1xf32> to vector<32x32xf32>
    %22 = arith.mulf %17, %21 : vector<32x32xf32>
    %23 = vector.broadcast %3 : vector<1x32xf32> to vector<32x32xf32>
    %24 = arith.mulf %22, %23 : vector<32x32xf32>
    %25 = vector.broadcast %4 : vector<1x32xf32> to vector<32x32xf32>
    %26 = arith.addf %24, %25 : vector<32x32xf32>
    %c0_11 = arith.constant 0 : index
    %c0_12 = arith.constant 0 : index
    %27 = vector.load %arg2[%c0_11, %c0_12] : memref<32x32xf32, #tpu.memory_space<vmem>>, vector<32x32xf32>
    %c0_13 = arith.constant 0 : index
    %c0_14 = arith.constant 0 : index
    %c0_15 = arith.constant 0 : index
    %28 = vector.load %arg6[%c0_13, %c0_14, %c0_15] : memref<2x32x96xf32, #tpu.memory_space<vmem>>, vector<1x32x96xf32>
    %29 = vector.shape_cast %28 : vector<1x32x96xf32> to vector<32x96xf32>
    %cst_16 = arith.constant dense<0.000000e+00> : vector<32x96xf32>
    %30 = tpu.matmul %26, %29, %cst_16 {dimension_numbers = #tpu.dot_dimension_numbers<[1], [0], [0], [1], [0, 0, 1, 1], [], []>} : vector<32x32xf32>, vector<32x96xf32>, vector<32x96xf32> -> vector<32x96xf32>
    %c0_17 = arith.constant 0 : index
    %c0_18 = arith.constant 0 : index
    %c0_19 = arith.constant 0 : index
    %31 = vector.load %arg7[%c0_17, %c0_18, %c0_19] : memref<2x1x96xf32, #tpu.memory_space<vmem>>, vector<1x1x96xf32>
    %32 = vector.shape_cast %31 : vector<1x1x96xf32> to vector<1x96xf32>
    %33 = vector.broadcast %32 : vector<1x96xf32> to vector<32x96xf32>
    %34 = arith.addf %30, %33 : vector<32x96xf32>
    %35 = vector.extract_strided_slice %34 {offsets = [0, 0], sizes = [32, 16], strides = [1, 1]} : vector<32x96xf32> to vector<32x16xf32>
    %cst_20 = arith.constant 2.500000e-01 : f32
    %36 = vector.broadcast %cst_20 : f32 to vector<32x16xf32>
    %37 = arith.mulf %35, %36 : vector<32x16xf32>
    %38 = vector.extract_strided_slice %34 {offsets = [0, 32], sizes = [32, 16], strides = [1, 1]} : vector<32x96xf32> to vector<32x16xf32>
    %39 = vector.extract_strided_slice %34 {offsets = [0, 64], sizes = [32, 16], strides = [1, 1]} : vector<32x96xf32> to vector<32x16xf32>
    %cst_21 = arith.constant dense<0.000000e+00> : vector<32x32xf32>
    %40 = tpu.matmul %37, %38, %cst_21 {dimension_numbers = #tpu.dot_dimension_numbers<[1], [1], [0], [0], [0, 0, 1, 0], [], []>} : vector<32x16xf32>, vector<32x16xf32>, vector<32x32xf32> -> vector<32x32xf32>
    %41 = arith.addf %40, %27 : vector<32x32xf32>
    %cst_22 = arith.constant dense<0xFF800000> : vector<32xf32>
    %42 = vector.multi_reduction <maximumf>, %41, %cst_22 [1] : vector<32x32xf32> to vector<32xf32>
    %43 = vector.shape_cast %42 : vector<32xf32> to vector<32x1xf32>
    %44 = vector.broadcast %43 : vector<32x1xf32> to vector<32x32xf32>
    %45 = arith.subf %41, %44 : vector<32x32xf32>
    %46 = math.exp %45 : vector<32x32xf32>
    %cst_23 = arith.constant dense<0.000000e+00> : vector<32xf32>
    %47 = vector.multi_reduction <add>, %46, %cst_23 [1] : vector<32x32xf32> to vector<32xf32>
    %48 = vector.shape_cast %47 : vector<32xf32> to vector<32x1xf32>
    %49 = tpu.reciprocal %48 {approx = true} : vector<32x1xf32> -> vector<32x1xf32>
    %50 = vector.broadcast %49 : vector<32x1xf32> to vector<32x32xf32>
    %51 = arith.mulf %46, %50 : vector<32x32xf32>
    %cst_24 = arith.constant dense<0.000000e+00> : vector<32x16xf32>
    %52 = tpu.matmul %51, %39, %cst_24 {dimension_numbers = #tpu.dot_dimension_numbers<[1], [0], [0], [1], [0, 0, 1, 1], [], []>} : vector<32x32xf32>, vector<32x16xf32>, vector<32x16xf32> -> vector<32x16xf32>
    %53 = vector.extract_strided_slice %34 {offsets = [0, 16], sizes = [32, 16], strides = [1, 1]} : vector<32x96xf32> to vector<32x16xf32>
    %cst_25 = arith.constant 2.500000e-01 : f32
    %54 = vector.broadcast %cst_25 : f32 to vector<32x16xf32>
    %55 = arith.mulf %53, %54 : vector<32x16xf32>
    %56 = vector.extract_strided_slice %34 {offsets = [0, 48], sizes = [32, 16], strides = [1, 1]} : vector<32x96xf32> to vector<32x16xf32>
    %57 = vector.extract_strided_slice %34 {offsets = [0, 80], sizes = [32, 16], strides = [1, 1]} : vector<32x96xf32> to vector<32x16xf32>
    %cst_26 = arith.constant dense<0.000000e+00> : vector<32x32xf32>
    %58 = tpu.matmul %55, %56, %cst_26 {dimension_numbers = #tpu.dot_dimension_numbers<[1], [1], [0], [0], [0, 0, 1, 0], [], []>} : vector<32x16xf32>, vector<32x16xf32>, vector<32x32xf32> -> vector<32x32xf32>
    %59 = arith.addf %58, %27 : vector<32x32xf32>
    %cst_27 = arith.constant dense<0xFF800000> : vector<32xf32>
    %60 = vector.multi_reduction <maximumf>, %59, %cst_27 [1] : vector<32x32xf32> to vector<32xf32>
    %61 = vector.shape_cast %60 : vector<32xf32> to vector<32x1xf32>
    %62 = vector.broadcast %61 : vector<32x1xf32> to vector<32x32xf32>
    %63 = arith.subf %59, %62 : vector<32x32xf32>
    %64 = math.exp %63 : vector<32x32xf32>
    %cst_28 = arith.constant dense<0.000000e+00> : vector<32xf32>
    %65 = vector.multi_reduction <add>, %64, %cst_28 [1] : vector<32x32xf32> to vector<32xf32>
    %66 = vector.shape_cast %65 : vector<32xf32> to vector<32x1xf32>
    %67 = tpu.reciprocal %66 {approx = true} : vector<32x1xf32> -> vector<32x1xf32>
    %68 = vector.broadcast %67 : vector<32x1xf32> to vector<32x32xf32>
    %69 = arith.mulf %64, %68 : vector<32x32xf32>
    %cst_29 = arith.constant dense<0.000000e+00> : vector<32x16xf32>
    %70 = tpu.matmul %69, %57, %cst_29 {dimension_numbers = #tpu.dot_dimension_numbers<[1], [0], [0], [1], [0, 0, 1, 1], [], []>} : vector<32x32xf32>, vector<32x16xf32>, vector<32x16xf32> -> vector<32x16xf32>
    %71 = tpu.concatenate %52, %70 in 1 : vector<32x16xf32>, vector<32x16xf32> -> vector<32x32xf32>
    %c0_30 = arith.constant 0 : index
    %c0_31 = arith.constant 0 : index
    %c0_32 = arith.constant 0 : index
    %72 = vector.load %arg8[%c0_30, %c0_31, %c0_32] : memref<2x32x32xf32, #tpu.memory_space<vmem>>, vector<1x32x32xf32>
    %73 = vector.shape_cast %72 : vector<1x32x32xf32> to vector<32x32xf32>
    %cst_33 = arith.constant dense<0.000000e+00> : vector<32x32xf32>
    %74 = tpu.matmul %71, %73, %cst_33 {dimension_numbers = #tpu.dot_dimension_numbers<[1], [0], [0], [1], [0, 0, 1, 1], [], []>} : vector<32x32xf32>, vector<32x32xf32>, vector<32x32xf32> -> vector<32x32xf32>
    %c0_34 = arith.constant 0 : index
    %c0_35 = arith.constant 0 : index
    %c0_36 = arith.constant 0 : index
    %75 = vector.load %arg9[%c0_34, %c0_35, %c0_36] : memref<2x1x32xf32, #tpu.memory_space<vmem>>, vector<1x1x32xf32>
    %76 = vector.shape_cast %75 : vector<1x1x32xf32> to vector<1x32xf32>
    %77 = vector.broadcast %76 : vector<1x32xf32> to vector<32x32xf32>
    %78 = arith.addf %74, %77 : vector<32x32xf32>
    %c0_37 = arith.constant 0 : index
    %c0_38 = arith.constant 0 : index
    %c0_39 = arith.constant 0 : index
    %79 = vector.load %arg10[%c0_37, %c0_38, %c0_39] : memref<2x2x32xf32, #tpu.memory_space<vmem>>, vector<1x2x32xf32>
    %80 = vector.shape_cast %79 : vector<1x2x32xf32> to vector<2x32xf32>
    %81 = arith.addf %26, %78 : vector<32x32xf32>
    %82 = vector.extract_strided_slice %80 {offsets = [0, 0], sizes = [1, 32], strides = [1, 1]} : vector<2x32xf32> to vector<1x32xf32>
    %83 = vector.extract_strided_slice %80 {offsets = [1, 0], sizes = [1, 32], strides = [1, 1]} : vector<2x32xf32> to vector<1x32xf32>
    %cst_40 = arith.constant dense<0.000000e+00> : vector<32xf32>
    %84 = vector.multi_reduction <add>, %81, %cst_40 [1] : vector<32x32xf32> to vector<32xf32>
    %85 = vector.shape_cast %84 : vector<32xf32> to vector<32x1xf32>
    %cst_41 = arith.constant 3.200000e+01 : f32
    %86 = vector.broadcast %cst_41 : f32 to vector<32x1xf32>
    %87 = arith.divf %85, %86 : vector<32x1xf32>
    %88 = vector.broadcast %87 : vector<32x1xf32> to vector<32x32xf32>
    %89 = arith.subf %81, %88 : vector<32x32xf32>
    %90 = arith.mulf %89, %89 : vector<32x32xf32>
    %cst_42 = arith.constant dense<0.000000e+00> : vector<32xf32>
    %91 = vector.multi_reduction <add>, %90, %cst_42 [1] : vector<32x32xf32> to vector<32xf32>
    %92 = vector.shape_cast %91 : vector<32xf32> to vector<32x1xf32>
    %cst_43 = arith.constant 3.200000e+01 : f32
    %93 = vector.broadcast %cst_43 : f32 to vector<32x1xf32>
    %94 = arith.divf %92, %93 : vector<32x1xf32>
    %95 = vector.broadcast %87 : vector<32x1xf32> to vector<32x32xf32>
    %96 = arith.subf %81, %95 : vector<32x32xf32>
    %cst_44 = arith.constant 9.99999974E-6 : f32
    %97 = vector.broadcast %cst_44 : f32 to vector<32x1xf32>
    %98 = arith.addf %94, %97 : vector<32x1xf32>
    %99 = math.rsqrt %98 : vector<32x1xf32>
    %100 = vector.broadcast %99 : vector<32x1xf32> to vector<32x32xf32>
    %101 = arith.mulf %96, %100 : vector<32x32xf32>
    %102 = vector.broadcast %82 : vector<1x32xf32> to vector<32x32xf32>
    %103 = arith.mulf %101, %102 : vector<32x32xf32>
    %104 = vector.broadcast %83 : vector<1x32xf32> to vector<32x32xf32>
    %105 = arith.addf %103, %104 : vector<32x32xf32>
    %c0_45 = arith.constant 0 : index
    %c0_46 = arith.constant 0 : index
    %c0_47 = arith.constant 0 : index
    %106 = vector.load %arg11[%c0_45, %c0_46, %c0_47] : memref<2x32x64xf32, #tpu.memory_space<vmem>>, vector<1x32x64xf32>
    %107 = vector.shape_cast %106 : vector<1x32x64xf32> to vector<32x64xf32>
    %cst_48 = arith.constant dense<0.000000e+00> : vector<32x64xf32>
    %108 = tpu.matmul %105, %107, %cst_48 {dimension_numbers = #tpu.dot_dimension_numbers<[1], [0], [0], [1], [0, 0, 1, 1], [], []>} : vector<32x32xf32>, vector<32x64xf32>, vector<32x64xf32> -> vector<32x64xf32>
    %c0_49 = arith.constant 0 : index
    %c0_50 = arith.constant 0 : index
    %c0_51 = arith.constant 0 : index
    %109 = vector.load %arg12[%c0_49, %c0_50, %c0_51] : memref<2x1x64xf32, #tpu.memory_space<vmem>>, vector<1x1x64xf32>
    %110 = vector.shape_cast %109 : vector<1x1x64xf32> to vector<1x64xf32>
    %111 = vector.broadcast %110 : vector<1x64xf32> to vector<32x64xf32>
    %112 = arith.addf %108, %111 : vector<32x64xf32>
    %113 = arith.mulf %112, %112 : vector<32x64xf32>
    %114 = arith.mulf %112, %113 : vector<32x64xf32>
    %cst_52 = arith.constant 4.471500e-02 : f32
    %115 = vector.broadcast %cst_52 : f32 to vector<32x64xf32>
    %116 = arith.mulf %115, %114 : vector<32x64xf32>
    %117 = arith.addf %112, %116 : vector<32x64xf32>
    %cst_53 = arith.constant 0.797884583 : f32
    %118 = vector.broadcast %cst_53 : f32 to vector<32x64xf32>
    %119 = arith.mulf %118, %117 : vector<32x64xf32>
    %120 = math.tanh %119 : vector<32x64xf32>
    %cst_54 = arith.constant 1.000000e+00 : f32
    %121 = vector.broadcast %cst_54 : f32 to vector<32x64xf32>
    %122 = arith.addf %121, %120 : vector<32x64xf32>
    %cst_55 = arith.constant 5.000000e-01 : f32
    %123 = vector.broadcast %cst_55 : f32 to vector<32x64xf32>
    %124 = arith.mulf %123, %122 : vector<32x64xf32>
    %125 = arith.mulf %112, %124 : vector<32x64xf32>
    %c0_56 = arith.constant 0 : index
    %c0_57 = arith.constant 0 : index
    %c0_58 = arith.constant 0 : index
    %126 = vector.load %arg13[%c0_56, %c0_57, %c0_58] : memref<2x64x32xf32, #tpu.memory_space<vmem>>, vector<1x64x32xf32>
    %127 = vector.shape_cast %126 : vector<1x64x32xf32> to vector<64x32xf32>
    %cst_59 = arith.constant dense<0.000000e+00> : vector<32x32xf32>
    %128 = tpu.matmul %125, %127, %cst_59 {dimension_numbers = #tpu.dot_dimension_numbers<[1], [0], [0], [1], [0, 0, 1, 1], [], []>} : vector<32x64xf32>, vector<64x32xf32>, vector<32x32xf32> -> vector<32x32xf32>
    %c0_60 = arith.constant 0 : index
    %c0_61 = arith.constant 0 : index
    %c0_62 = arith.constant 0 : index
    %129 = vector.load %arg14[%c0_60, %c0_61, %c0_62] : memref<2x1x32xf32, #tpu.memory_space<vmem>>, vector<1x1x32xf32>
    %130 = vector.shape_cast %129 : vector<1x1x32xf32> to vector<1x32xf32>
    %131 = vector.broadcast %130 : vector<1x32xf32> to vector<32x32xf32>
    %132 = arith.addf %128, %131 : vector<32x32xf32>
    %c0_63 = arith.constant 0 : index
    %c0_64 = arith.constant 0 : index
    %c0_65 = arith.constant 0 : index
    %133 = vector.load %arg15[%c0_63, %c0_64, %c0_65] : memref<2x2x32xf32, #tpu.memory_space<vmem>>, vector<1x2x32xf32>
    %134 = vector.shape_cast %133 : vector<1x2x32xf32> to vector<2x32xf32>
    %135 = arith.addf %105, %132 : vector<32x32xf32>
    %136 = vector.extract_strided_slice %134 {offsets = [0, 0], sizes = [1, 32], strides = [1, 1]} : vector<2x32xf32> to vector<1x32xf32>
    %137 = vector.extract_strided_slice %134 {offsets = [1, 0], sizes = [1, 32], strides = [1, 1]} : vector<2x32xf32> to vector<1x32xf32>
    %cst_66 = arith.constant dense<0.000000e+00> : vector<32xf32>
    %138 = vector.multi_reduction <add>, %135, %cst_66 [1] : vector<32x32xf32> to vector<32xf32>
    %139 = vector.shape_cast %138 : vector<32xf32> to vector<32x1xf32>
    %cst_67 = arith.constant 3.200000e+01 : f32
    %140 = vector.broadcast %cst_67 : f32 to vector<32x1xf32>
    %141 = arith.divf %139, %140 : vector<32x1xf32>
    %142 = vector.broadcast %141 : vector<32x1xf32> to vector<32x32xf32>
    %143 = arith.subf %135, %142 : vector<32x32xf32>
    %144 = arith.mulf %143, %143 : vector<32x32xf32>
    %cst_68 = arith.constant dense<0.000000e+00> : vector<32xf32>
    %145 = vector.multi_reduction <add>, %144, %cst_68 [1] : vector<32x32xf32> to vector<32xf32>
    %146 = vector.shape_cast %145 : vector<32xf32> to vector<32x1xf32>
    %cst_69 = arith.constant 3.200000e+01 : f32
    %147 = vector.broadcast %cst_69 : f32 to vector<32x1xf32>
    %148 = arith.divf %146, %147 : vector<32x1xf32>
    %149 = vector.broadcast %141 : vector<32x1xf32> to vector<32x32xf32>
    %150 = arith.subf %135, %149 : vector<32x32xf32>
    %cst_70 = arith.constant 9.99999974E-6 : f32
    %151 = vector.broadcast %cst_70 : f32 to vector<32x1xf32>
    %152 = arith.addf %148, %151 : vector<32x1xf32>
    %153 = math.rsqrt %152 : vector<32x1xf32>
    %154 = vector.broadcast %153 : vector<32x1xf32> to vector<32x32xf32>
    %155 = arith.mulf %150, %154 : vector<32x32xf32>
    %156 = vector.broadcast %136 : vector<1x32xf32> to vector<32x32xf32>
    %157 = arith.mulf %155, %156 : vector<32x32xf32>
    %158 = vector.broadcast %137 : vector<1x32xf32> to vector<32x32xf32>
    %159 = arith.addf %157, %158 : vector<32x32xf32>
    %c1 = arith.constant 1 : index
    %c0_71 = arith.constant 0 : index
    %c0_72 = arith.constant 0 : index
    %160 = vector.load %arg6[%c1, %c0_71, %c0_72] : memref<2x32x96xf32, #tpu.memory_space<vmem>>, vector<1x32x96xf32>
    %161 = vector.shape_cast %160 : vector<1x32x96xf32> to vector<32x96xf32>
    %cst_73 = arith.constant dense<0.000000e+00> : vector<32x96xf32>
    %162 = tpu.matmul %159, %161, %cst_73 {dimension_numbers = #tpu.dot_dimension_numbers<[1], [0], [0], [1], [0, 0, 1, 1], [], []>} : vector<32x32xf32>, vector<32x96xf32>, vector<32x96xf32> -> vector<32x96xf32>
    %c1_74 = arith.constant 1 : index
    %c0_75 = arith.constant 0 : index
    %c0_76 = arith.constant 0 : index
    %163 = vector.load %arg7[%c1_74, %c0_75, %c0_76] : memref<2x1x96xf32, #tpu.memory_space<vmem>>, vector<1x1x96xf32>
    %164 = vector.shape_cast %163 : vector<1x1x96xf32> to vector<1x96xf32>
    %165 = vector.broadcast %164 : vector<1x96xf32> to vector<32x96xf32>
    %166 = arith.addf %162, %165 : vector<32x96xf32>
    %167 = vector.extract_strided_slice %166 {offsets = [0, 0], sizes = [32, 16], strides = [1, 1]} : vector<32x96xf32> to vector<32x16xf32>
    %cst_77 = arith.constant 2.500000e-01 : f32
    %168 = vector.broadcast %cst_77 : f32 to vector<32x16xf32>
    %169 = arith.mulf %167, %168 : vector<32x16xf32>
    %170 = vector.extract_strided_slice %166 {offsets = [0, 32], sizes = [32, 16], strides = [1, 1]} : vector<32x96xf32> to vector<32x16xf32>
    %171 = vector.extract_strided_slice %166 {offsets = [0, 64], sizes = [32, 16], strides = [1, 1]} : vector<32x96xf32> to vector<32x16xf32>
    %cst_78 = arith.constant dense<0.000000e+00> : vector<32x32xf32>
    %172 = tpu.matmul %169, %170, %cst_78 {dimension_numbers = #tpu.dot_dimension_numbers<[1], [1], [0], [0], [0, 0, 1, 0], [], []>} : vector<32x16xf32>, vector<32x16xf32>, vector<32x32xf32> -> vector<32x32xf32>
    %173 = arith.addf %172, %27 : vector<32x32xf32>
    %cst_79 = arith.constant dense<0xFF800000> : vector<32xf32>
    %174 = vector.multi_reduction <maximumf>, %173, %cst_79 [1] : vector<32x32xf32> to vector<32xf32>
    %175 = vector.shape_cast %174 : vector<32xf32> to vector<32x1xf32>
    %176 = vector.broadcast %175 : vector<32x1xf32> to vector<32x32xf32>
    %177 = arith.subf %173, %176 : vector<32x32xf32>
    %178 = math.exp %177 : vector<32x32xf32>
    %cst_80 = arith.constant dense<0.000000e+00> : vector<32xf32>
    %179 = vector.multi_reduction <add>, %178, %cst_80 [1] : vector<32x32xf32> to vector<32xf32>
    %180 = vector.shape_cast %179 : vector<32xf32> to vector<32x1xf32>
    %181 = tpu.reciprocal %180 {approx = true} : vector<32x1xf32> -> vector<32x1xf32>
    %182 = vector.broadcast %181 : vector<32x1xf32> to vector<32x32xf32>
    %183 = arith.mulf %178, %182 : vector<32x32xf32>
    %cst_81 = arith.constant dense<0.000000e+00> : vector<32x16xf32>
    %184 = tpu.matmul %183, %171, %cst_81 {dimension_numbers = #tpu.dot_dimension_numbers<[1], [0], [0], [1], [0, 0, 1, 1], [], []>} : vector<32x32xf32>, vector<32x16xf32>, vector<32x16xf32> -> vector<32x16xf32>
    %185 = vector.extract_strided_slice %166 {offsets = [0, 16], sizes = [32, 16], strides = [1, 1]} : vector<32x96xf32> to vector<32x16xf32>
    %cst_82 = arith.constant 2.500000e-01 : f32
    %186 = vector.broadcast %cst_82 : f32 to vector<32x16xf32>
    %187 = arith.mulf %185, %186 : vector<32x16xf32>
    %188 = vector.extract_strided_slice %166 {offsets = [0, 48], sizes = [32, 16], strides = [1, 1]} : vector<32x96xf32> to vector<32x16xf32>
    %189 = vector.extract_strided_slice %166 {offsets = [0, 80], sizes = [32, 16], strides = [1, 1]} : vector<32x96xf32> to vector<32x16xf32>
    %cst_83 = arith.constant dense<0.000000e+00> : vector<32x32xf32>
    %190 = tpu.matmul %187, %188, %cst_83 {dimension_numbers = #tpu.dot_dimension_numbers<[1], [1], [0], [0], [0, 0, 1, 0], [], []>} : vector<32x16xf32>, vector<32x16xf32>, vector<32x32xf32> -> vector<32x32xf32>
    %191 = arith.addf %190, %27 : vector<32x32xf32>
    %cst_84 = arith.constant dense<0xFF800000> : vector<32xf32>
    %192 = vector.multi_reduction <maximumf>, %191, %cst_84 [1] : vector<32x32xf32> to vector<32xf32>
    %193 = vector.shape_cast %192 : vector<32xf32> to vector<32x1xf32>
    %194 = vector.broadcast %193 : vector<32x1xf32> to vector<32x32xf32>
    %195 = arith.subf %191, %194 : vector<32x32xf32>
    %196 = math.exp %195 : vector<32x32xf32>
    %cst_85 = arith.constant dense<0.000000e+00> : vector<32xf32>
    %197 = vector.multi_reduction <add>, %196, %cst_85 [1] : vector<32x32xf32> to vector<32xf32>
    %198 = vector.shape_cast %197 : vector<32xf32> to vector<32x1xf32>
    %199 = tpu.reciprocal %198 {approx = true} : vector<32x1xf32> -> vector<32x1xf32>
    %200 = vector.broadcast %199 : vector<32x1xf32> to vector<32x32xf32>
    %201 = arith.mulf %196, %200 : vector<32x32xf32>
    %cst_86 = arith.constant dense<0.000000e+00> : vector<32x16xf32>
    %202 = tpu.matmul %201, %189, %cst_86 {dimension_numbers = #tpu.dot_dimension_numbers<[1], [0], [0], [1], [0, 0, 1, 1], [], []>} : vector<32x32xf32>, vector<32x16xf32>, vector<32x16xf32> -> vector<32x16xf32>
    %203 = tpu.concatenate %184, %202 in 1 : vector<32x16xf32>, vector<32x16xf32> -> vector<32x32xf32>
    %c1_87 = arith.constant 1 : index
    %c0_88 = arith.constant 0 : index
    %c0_89 = arith.constant 0 : index
    %204 = vector.load %arg8[%c1_87, %c0_88, %c0_89] : memref<2x32x32xf32, #tpu.memory_space<vmem>>, vector<1x32x32xf32>
    %205 = vector.shape_cast %204 : vector<1x32x32xf32> to vector<32x32xf32>
    %cst_90 = arith.constant dense<0.000000e+00> : vector<32x32xf32>
    %206 = tpu.matmul %203, %205, %cst_90 {dimension_numbers = #tpu.dot_dimension_numbers<[1], [0], [0], [1], [0, 0, 1, 1], [], []>} : vector<32x32xf32>, vector<32x32xf32>, vector<32x32xf32> -> vector<32x32xf32>
    %c1_91 = arith.constant 1 : index
    %c0_92 = arith.constant 0 : index
    %c0_93 = arith.constant 0 : index
    %207 = vector.load %arg9[%c1_91, %c0_92, %c0_93] : memref<2x1x32xf32, #tpu.memory_space<vmem>>, vector<1x1x32xf32>
    %208 = vector.shape_cast %207 : vector<1x1x32xf32> to vector<1x32xf32>
    %209 = vector.broadcast %208 : vector<1x32xf32> to vector<32x32xf32>
    %210 = arith.addf %206, %209 : vector<32x32xf32>
    %c1_94 = arith.constant 1 : index
    %c0_95 = arith.constant 0 : index
    %c0_96 = arith.constant 0 : index
    %211 = vector.load %arg10[%c1_94, %c0_95, %c0_96] : memref<2x2x32xf32, #tpu.memory_space<vmem>>, vector<1x2x32xf32>
    %212 = vector.shape_cast %211 : vector<1x2x32xf32> to vector<2x32xf32>
    %213 = arith.addf %159, %210 : vector<32x32xf32>
    %214 = vector.extract_strided_slice %212 {offsets = [0, 0], sizes = [1, 32], strides = [1, 1]} : vector<2x32xf32> to vector<1x32xf32>
    %215 = vector.extract_strided_slice %212 {offsets = [1, 0], sizes = [1, 32], strides = [1, 1]} : vector<2x32xf32> to vector<1x32xf32>
    %cst_97 = arith.constant dense<0.000000e+00> : vector<32xf32>
    %216 = vector.multi_reduction <add>, %213, %cst_97 [1] : vector<32x32xf32> to vector<32xf32>
    %217 = vector.shape_cast %216 : vector<32xf32> to vector<32x1xf32>
    %cst_98 = arith.constant 3.200000e+01 : f32
    %218 = vector.broadcast %cst_98 : f32 to vector<32x1xf32>
    %219 = arith.divf %217, %218 : vector<32x1xf32>
    %220 = vector.broadcast %219 : vector<32x1xf32> to vector<32x32xf32>
    %221 = arith.subf %213, %220 : vector<32x32xf32>
    %222 = arith.mulf %221, %221 : vector<32x32xf32>
    %cst_99 = arith.constant dense<0.000000e+00> : vector<32xf32>
    %223 = vector.multi_reduction <add>, %222, %cst_99 [1] : vector<32x32xf32> to vector<32xf32>
    %224 = vector.shape_cast %223 : vector<32xf32> to vector<32x1xf32>
    %cst_100 = arith.constant 3.200000e+01 : f32
    %225 = vector.broadcast %cst_100 : f32 to vector<32x1xf32>
    %226 = arith.divf %224, %225 : vector<32x1xf32>
    %227 = vector.broadcast %219 : vector<32x1xf32> to vector<32x32xf32>
    %228 = arith.subf %213, %227 : vector<32x32xf32>
    %cst_101 = arith.constant 9.99999974E-6 : f32
    %229 = vector.broadcast %cst_101 : f32 to vector<32x1xf32>
    %230 = arith.addf %226, %229 : vector<32x1xf32>
    %231 = math.rsqrt %230 : vector<32x1xf32>
    %232 = vector.broadcast %231 : vector<32x1xf32> to vector<32x32xf32>
    %233 = arith.mulf %228, %232 : vector<32x32xf32>
    %234 = vector.broadcast %214 : vector<1x32xf32> to vector<32x32xf32>
    %235 = arith.mulf %233, %234 : vector<32x32xf32>
    %236 = vector.broadcast %215 : vector<1x32xf32> to vector<32x32xf32>
    %237 = arith.addf %235, %236 : vector<32x32xf32>
    %c1_102 = arith.constant 1 : index
    %c0_103 = arith.constant 0 : index
    %c0_104 = arith.constant 0 : index
    %238 = vector.load %arg11[%c1_102, %c0_103, %c0_104] : memref<2x32x64xf32, #tpu.memory_space<vmem>>, vector<1x32x64xf32>
    %239 = vector.shape_cast %238 : vector<1x32x64xf32> to vector<32x64xf32>
    %cst_105 = arith.constant dense<0.000000e+00> : vector<32x64xf32>
    %240 = tpu.matmul %237, %239, %cst_105 {dimension_numbers = #tpu.dot_dimension_numbers<[1], [0], [0], [1], [0, 0, 1, 1], [], []>} : vector<32x32xf32>, vector<32x64xf32>, vector<32x64xf32> -> vector<32x64xf32>
    %c1_106 = arith.constant 1 : index
    %c0_107 = arith.constant 0 : index
    %c0_108 = arith.constant 0 : index
    %241 = vector.load %arg12[%c1_106, %c0_107, %c0_108] : memref<2x1x64xf32, #tpu.memory_space<vmem>>, vector<1x1x64xf32>
    %242 = vector.shape_cast %241 : vector<1x1x64xf32> to vector<1x64xf32>
    %243 = vector.broadcast %242 : vector<1x64xf32> to vector<32x64xf32>
    %244 = arith.addf %240, %243 : vector<32x64xf32>
    %245 = arith.mulf %244, %244 : vector<32x64xf32>
    %246 = arith.mulf %244, %245 : vector<32x64xf32>
    %cst_109 = arith.constant 4.471500e-02 : f32
    %247 = vector.broadcast %cst_109 : f32 to vector<32x64xf32>
    %248 = arith.mulf %247, %246 : vector<32x64xf32>
    %249 = arith.addf %244, %248 : vector<32x64xf32>
    %cst_110 = arith.constant 0.797884583 : f32
    %250 = vector.broadcast %cst_110 : f32 to vector<32x64xf32>
    %251 = arith.mulf %250, %249 : vector<32x64xf32>
    %252 = math.tanh %251 : vector<32x64xf32>
    %cst_111 = arith.constant 1.000000e+00 : f32
    %253 = vector.broadcast %cst_111 : f32 to vector<32x64xf32>
    %254 = arith.addf %253, %252 : vector<32x64xf32>
    %cst_112 = arith.constant 5.000000e-01 : f32
    %255 = vector.broadcast %cst_112 : f32 to vector<32x64xf32>
    %256 = arith.mulf %255, %254 : vector<32x64xf32>
    %257 = arith.mulf %244, %256 : vector<32x64xf32>
    %c1_113 = arith.constant 1 : index
    %c0_114 = arith.constant 0 : index
    %c0_115 = arith.constant 0 : index
    %258 = vector.load %arg13[%c1_113, %c0_114, %c0_115] : memref<2x64x32xf32, #tpu.memory_space<vmem>>, vector<1x64x32xf32>
    %259 = vector.shape_cast %258 : vector<1x64x32xf32> to vector<64x32xf32>
    %cst_116 = arith.constant dense<0.000000e+00> : vector<32x32xf32>
    %260 = tpu.matmul %257, %259, %cst_116 {dimension_numbers = #tpu.dot_dimension_numbers<[1], [0], [0], [1], [0, 0, 1, 1], [], []>} : vector<32x64xf32>, vector<64x32xf32>, vector<32x32xf32> -> vector<32x32xf32>
    %c1_117 = arith.constant 1 : index
    %c0_118 = arith.constant 0 : index
    %c0_119 = arith.constant 0 : index
    %261 = vector.load %arg14[%c1_117, %c0_118, %c0_119] : memref<2x1x32xf32, #tpu.memory_space<vmem>>, vector<1x1x32xf32>
    %262 = vector.shape_cast %261 : vector<1x1x32xf32> to vector<1x32xf32>
    %263 = vector.broadcast %262 : vector<1x32xf32> to vector<32x32xf32>
    %264 = arith.addf %260, %263 : vector<32x32xf32>
    %c1_120 = arith.constant 1 : index
    %c0_121 = arith.constant 0 : index
    %c0_122 = arith.constant 0 : index
    %265 = vector.load %arg15[%c1_120, %c0_121, %c0_122] : memref<2x2x32xf32, #tpu.memory_space<vmem>>, vector<1x2x32xf32>
    %266 = vector.shape_cast %265 : vector<1x2x32xf32> to vector<2x32xf32>
    %267 = arith.addf %237, %264 : vector<32x32xf32>
    %268 = vector.extract_strided_slice %266 {offsets = [0, 0], sizes = [1, 32], strides = [1, 1]} : vector<2x32xf32> to vector<1x32xf32>
    %269 = vector.extract_strided_slice %266 {offsets = [1, 0], sizes = [1, 32], strides = [1, 1]} : vector<2x32xf32> to vector<1x32xf32>
    %cst_123 = arith.constant dense<0.000000e+00> : vector<32xf32>
    %270 = vector.multi_reduction <add>, %267, %cst_123 [1] : vector<32x32xf32> to vector<32xf32>
    %271 = vector.shape_cast %270 : vector<32xf32> to vector<32x1xf32>
    %cst_124 = arith.constant 3.200000e+01 : f32
    %272 = vector.broadcast %cst_124 : f32 to vector<32x1xf32>
    %273 = arith.divf %271, %272 : vector<32x1xf32>
    %274 = vector.broadcast %273 : vector<32x1xf32> to vector<32x32xf32>
    %275 = arith.subf %267, %274 : vector<32x32xf32>
    %276 = arith.mulf %275, %275 : vector<32x32xf32>
    %cst_125 = arith.constant dense<0.000000e+00> : vector<32xf32>
    %277 = vector.multi_reduction <add>, %276, %cst_125 [1] : vector<32x32xf32> to vector<32xf32>
    %278 = vector.shape_cast %277 : vector<32xf32> to vector<32x1xf32>
    %cst_126 = arith.constant 3.200000e+01 : f32
    %279 = vector.broadcast %cst_126 : f32 to vector<32x1xf32>
    %280 = arith.divf %278, %279 : vector<32x1xf32>
    %281 = vector.broadcast %273 : vector<32x1xf32> to vector<32x32xf32>
    %282 = arith.subf %267, %281 : vector<32x32xf32>
    %cst_127 = arith.constant 9.99999974E-6 : f32
    %283 = vector.broadcast %cst_127 : f32 to vector<32x1xf32>
    %284 = arith.addf %280, %283 : vector<32x1xf32>
    %285 = math.rsqrt %284 : vector<32x1xf32>
    %286 = vector.broadcast %285 : vector<32x1xf32> to vector<32x32xf32>
    %287 = arith.mulf %282, %286 : vector<32x32xf32>
    %288 = vector.broadcast %268 : vector<1x32xf32> to vector<32x32xf32>
    %289 = arith.mulf %287, %288 : vector<32x32xf32>
    %290 = vector.broadcast %269 : vector<1x32xf32> to vector<32x32xf32>
    %291 = arith.addf %289, %290 : vector<32x32xf32>
    %c0_128 = arith.constant 0 : index
    %c0_129 = arith.constant 0 : index
    %292 = vector.load %arg3[%c0_128, %c0_129] : memref<4x32xf32, #tpu.memory_space<vmem>>, vector<4x32xf32>
    %cst_130 = arith.constant dense<0.000000e+00> : vector<4x32xf32>
    %293 = tpu.matmul %292, %291, %cst_130 {dimension_numbers = #tpu.dot_dimension_numbers<[1], [0], [0], [1], [0, 0, 1, 1], [], []>} : vector<4x32xf32>, vector<32x32xf32>, vector<4x32xf32> -> vector<4x32xf32>
    %294 = arith.mulf %293, %293 : vector<4x32xf32>
    %cst_131 = arith.constant dense<0.000000e+00> : vector<4xf32>
    %295 = vector.multi_reduction <add>, %294, %cst_131 [1] : vector<4x32xf32> to vector<4xf32>
    %296 = vector.shape_cast %295 : vector<4xf32> to vector<4x1xf32>
    %cst_132 = arith.constant 1.000000e-24 : f32
    %297 = vector.broadcast %cst_132 : f32 to vector<4x1xf32>
    %298 = arith.maximumf %296, %297 : vector<4x1xf32>
    %299 = math.rsqrt %298 : vector<4x1xf32>
    %300 = vector.broadcast %299 : vector<4x1xf32> to vector<4x32xf32>
    %301 = arith.mulf %293, %300 : vector<4x32xf32>
    %c0_133 = arith.constant 0 : index
    %c0_134 = arith.constant 0 : index
    %302 = vector.load %arg16[%c0_133, %c0_134] : memref<4x32xf32, #tpu.memory_space<vmem>>, vector<4x32xf32>
    tpu.vector_store %arg16[%c0_133, %c0_134], %301 {strides = array<i32>} : memref<4x32xf32, #tpu.memory_space<vmem>>, vector<4x32xf32>,
    return
  }
}

</mosaic_0001>

<bundles_post_ra>
// kernel: barlow_twins_forward.1
= control target key start
LH: loop header
LB: loop body
LE: loop exit
PB: predicated region body
PF: predicated region fallthrough
CT: control target
= control target key end

     0   :  { %vm67_vm0 = vcmask 261120   ;;  %vm269_vm1 = vcmask 130048   ;;  %s3498_s19 = smov 96   ;;  %s3499_s27 = smov 64   ;;  %vm1158_vm3 = vcmask 523264   ;;  %vm3505_vm4 = vmmov 0   ;;  %s4187_s0 = inlined_call_operand.vmem [shape: f32[32,32], index: 0, kind: input, shape index: {}]   ;;  %s4188_s1 = inlined_call_operand.vmem [shape: f32[32,32], index: 1, kind: input, shape index: {}]   ;;  %s4189_s6 = inlined_call_operand.vmem [shape: f32[2,32,96], index: 6, kind: input, shape index: {}]   ;;  %s4190_s4 = inlined_call_operand.vmem [shape: f32[1,32], index: 4, kind: input, shape index: {}]   ;;  %s4191_s5 = inlined_call_operand.vmem [shape: f32[1,32], index: 5, kind: input, shape index: {}]   ;;  %s4192_s7 = inlined_call_operand.vmem [shape: f32[2,1,96], index: 7, kind: input, shape index: {}]   ;;  %s4193_s2 = inlined_call_operand.vmem [shape: f32[32,32], index: 2, kind: input, shape index: {}]   ;;  %s4194_s8 = inlined_call_operand.vmem [shape: f32[2,32,32], index: 8, kind: input, shape index: {}]   ;;  %s4195_s9 = inlined_call_operand.vmem [shape: f32[2,1,32], index: 9, kind: input, shape index: {}]   ;;  %s4196_s11 = inlined_call_operand.vmem [shape: f32[2,32,64], index: 11, kind: input, shape index: {}]   ;;  %s4197_s10 = inlined_call_operand.vmem [shape: f32[2,2,32], index: 10, kind: input, shape index: {}]   ;;  %s4198_s13 = inlined_call_operand.vmem [shape: f32[2,64,32], index: 13, kind: input, shape index: {}]   ;;  %s4199_s12 = inlined_call_operand.vmem [shape: f32[2,1,64], index: 12, kind: input, shape index: {}]   ;;  %s4200_s14 = inlined_call_operand.vmem [shape: f32[2,1,32], index: 14, kind: input, shape index: {}]   ;;  %s4201_s15 = inlined_call_operand.vmem [shape: f32[2,2,32], index: 15, kind: input, shape index: {}]   ;;  %s4202_s3 = inlined_call_operand.vmem [shape: f32[4,32], index: 3, kind: input, shape index: {}]   ;;  %s4203_s16 = inlined_call_operand.vmem [shape: f32[4,32], index: 16, kind: output, shape index: {}]  }
   0x1   :  { %4205 = sst [smem:[#allocation2_spill]] %s4187_s0  ;;  %v57_v1 = vld [vmem:[%s4188_s1] sm:$0xff]  ;;  %v59_v4 = vld [vmem:[%s4188_s1 + $0x10] sm:$0xff]  ;;  %v58_v6 = vld [vmem:[%s4188_s1 + $0x8] sm:$0xff]  ;;  %s3500_s28 = smov 80   ;;  %vm2596_vm5 = vcmask 257024  }
   0x2   :  { %s4206_s23 = sld [smem:[#allocation2_spill]]  ;;  %v60_v10 = vld [vmem:[%s4188_s1 + $0x18] sm:$0xff]  ;;  %v145_v36 = vld [vmem:[%s4189_s6] sm:$0xff]  ;;  %v146_v37 = vld [vmem:[%s4189_s6 + $0x8] sm:$0xff]  ;;  %s3501_s29 = smov 112  }
   0x3   :  { %v147_v38 = vld [vmem:[%s4189_s6 + $0x10] sm:$0xff]  ;;  %v3117_v39 = vpack.c.bf16 %v146_v37, %v145_v36  ;;  %v148_v40 = vld [vmem:[%s4189_s6 + $0x18] sm:$0xff]  ;;  %v2608_v55 = vld [vmem:[%s4190_s4] ss:$0 sm:$0xff]  ;;  %s3502_s30 = smov 48   ;;  %s3503_s1 = smov 16  }
   0x4   :  { %v3121_v41 = vpack.c.bf16 %v148_v40, %v147_v38  ;;  %v2609_v57 = vld [vmem:[%s4191_s5] ss:$0 sm:$0xff]  ;;  %vm3675_vm2 = vmpackc.low %vm269_vm1, %vm269_vm1  ;;  %v3705_v38 = vld [vmem:[%s4193_s2 + $0x18] sm:$0xff] }
   0x5   :  { %3118 = vmatprep.subr.bf16.mxu1 %v3117_v39  ;;  %v3711_v40 = vld [vmem:[%s4193_s2 + $0x10] sm:$0xff] }
   0x6   :  { %3120 = vmatpush3.bf16.msra.mxu1 %v3117_v39 }
   0x7   :  { %3122 = vmatprep.subr.bf16.mxu1 %v3121_v41 }
   0x8   :  { %v53_v0 = vld [vmem:[%s4206_s23] sm:$0xff]  ;;  %v55_v2 = vld [vmem:[%s4206_s23 + $0x10] sm:$0xff]  ;;  %v54_v5 = vld [vmem:[%s4206_s23 + $0x8] sm:$0xff] }
   0x9   :  { %v61_v3 = vadd.f32 %v57_v1, %v53_v0  ;;  %v63_v7 = vadd.f32 %v59_v4, %v55_v2  ;;  %v62_v8 = vadd.f32 %v58_v6, %v54_v5  ;;  %v56_v9 = vld [vmem:[%s4206_s23 + $0x18] sm:$0xff] }
   0xa   :  { %v64_v12 = vadd.f32 %v60_v10, %v56_v9  ;;  %3124 = vmatpush3.bf16.msra.mxu1 %v3121_v41 }
   0xb   :  { %v68_v11 = vsel %vm67_vm0, %v61_v3, 0.0  ;;  %v74_v13 = vsel %vm67_vm0, %v63_v7, 0.0  ;;  %v71_v14 = vsel %vm67_vm0, %v62_v8, 0.0 }
   0xc   :  { %69 = vadd.xlane.f32.xlu0 %v68_v11  ;;  %75 = vadd.xlane.f32.xlu1 %v74_v13  ;;  %v77_v15 = vsel %vm67_vm0, %v64_v12, 0.0 }
  0x10   :  { %72 = vadd.xlane.f32.xlu0 %v71_v14  ;;  %78 = vadd.xlane.f32.xlu1 %v77_v15 }
  0x99   :  { %v70_v16 = vpop.xlane.xlu0 %69  ;;  %v76_v18 = vpop.xlane.xlu1 %75 }
  0x9a   :  { %v81_v17 = vmul.f32 0.03125, %v70_v16  ;;  %v83_v19 = vmul.f32 0.03125, %v76_v18 }
  0x9c   :  { %v85_v20 = vsub.f32 %v61_v3, %v81_v17  ;;  %v87_v21 = vsub.f32 %v63_v7, %v83_v19 }
  0x9d   :  { %v73_v22 = vpop.xlane.xlu0 %72  ;;  %v79_v24 = vpop.xlane.xlu1 %78 }
  0x9e   :  { %v82_v23 = vmul.f32 0.03125, %v73_v22  ;;  %v89_v25 = vmul.f32 %v85_v20, %v85_v20  ;;  %v84_v26 = vmul.f32 0.03125, %v79_v24  ;;  %v91_v27 = vmul.f32 %v87_v21, %v87_v21 }
  0xa0   :  { %v86_v28 = vsub.f32 %v62_v8, %v82_v23  ;;  %v93_v29 = vsel %vm67_vm0, %v89_v25, 0.0  ;;  %v88_v30 = vsub.f32 %v64_v12, %v84_v26  ;;  %v99_v31 = vsel %vm67_vm0, %v91_v27, 0.0  ;;  %v2610_v8 = vld [vmem:[%s4192_s7] ss:$0 sm:$0xff] }
  0xa1   :  { %94 = vadd.xlane.f32.xlu0 %v93_v29 }
  0xa2   :  { %v90_v32 = vmul.f32 %v86_v28, %v86_v28  ;;  %v92_v33 = vmul.f32 %v88_v30, %v88_v30 }
  0xa4   :  { %v96_v34 = vsel %vm67_vm0, %v90_v32, 0.0  ;;  %v102_v35 = vsel %vm67_vm0, %v92_v33, 0.0  ;;  %v3693_v32 = vld [vmem:[%s4193_s2 + $0x8] sm:$0xff]  ;;  %v3698_v33 = vld [vmem:[%s4193_s2] sm:$0xff] }
  0xa5   :  { %100 = vadd.xlane.f32.xlu0 %v99_v31  ;;  %97 = vadd.xlane.f32.xlu1 %v96_v34 }
  0xa9   :  { %103 = vadd.xlane.f32.xlu1 %v102_v35 }
 0x12e   :  { %v95_v42 = vpop.xlane.xlu0 %94 }
 0x12f   :  { %v105_v43 = vmul.f32 0.03125, %v95_v42 }
 0x131   :  { %v109_v44 = vadd.f32 1e-05, %v105_v43 }
 0x132   :  { %v98_v45 = vpop.xlane.xlu1 %97  ;;  %v101_v46 = vpop.xlane.xlu0 %100 }
 0x133   :  { %3372 = vrsqrt.f32 %v109_v44  ;;  %v106_v47 = vmul.f32 0.03125, %v98_v45  ;;  %v107_v48 = vmul.f32 0.03125, %v101_v46 }
 0x135   :  { %v110_v49 = vadd.f32 1e-05, %v106_v47  ;;  %v111_v50 = vadd.f32 1e-05, %v107_v48 }
 0x136   :  { %v104_v51 = vpop.xlane.xlu1 %103 }
 0x137   :  { %3374 = vrsqrt.f32 %v110_v49  ;;  %v108_v52 = vmul.f32 0.03125, %v104_v51 }
 0x138   :  { %3376 = vrsqrt.f32 %v111_v50 }
 0x139   :  { %v112_v53 = vadd.f32 1e-05, %v108_v52 }
 0x13b   :  { %3378 = vrsqrt.f32 %v112_v53 }
 0x13d   :  { %v3373_v54 = vpop.eup %3372 }
 0x13e   :  { %v117_v56 = vmul.f32 %v3373_v54, %v85_v20 }
 0x140   :  { %v127_v58 = vmul.f32 %v2608_v55, %v117_v56 }
 0x141   :  { %v3375_v59 = vpop.eup %3374 }
 0x142   :  { %v3377_v60 = vpop.eup %3376  ;;  %v3642_v61 = vadd.f32 %v2609_v57, %v127_v58  ;;  %v118_v62 = vmul.f32 %v3375_v59, %v86_v28 }
 0x143   :  { %v119_v63 = vmul.f32 %v3377_v60, %v87_v21 }
 0x144   :  { %2874 = vmatprep.mubr.msk.f32.mxu1 %vm67_vm0, %v3642_v61  ;;  %v128_v0 = vmul.f32 %v2608_v55, %v118_v62 }
 0x145   :  { %v3379_v1 = vpop.eup %3378  ;;  %v129_v2 = vmul.f32 %v2608_v55, %v119_v63 }
 0x146   :  { %v3646_v3 = vadd.f32 %v2609_v57, %v128_v0  ;;  %v120_v4 = vmul.f32 %v3379_v1, %v88_v30 }
 0x147   :  { %v3648_v5 = vadd.f32 %v2609_v57, %v129_v2 }
 0x148   :  { %2875 = vmatmul.mubr.msk.f32.vlgmr.msra.gmra.mrb[0].mxu1 %vm67_vm0, %v3646_v3  ;;  %v130_v6 = vmul.f32 %v2608_v55, %v120_v4 }
 0x149   :  { %2877 = vmatprep.mubr.msk.f32.mxu1 %vm67_vm0, %v3648_v5 }
 0x14a   :  { %v3654_v7 = vadd.f32 %v2609_v57, %v130_v6 }
 0x14c   :  { %2878 = vmatmul.mubr.msk.f32.gmra.mrb[2].mxu1 %vm67_vm0, %v3654_v7 }
 0x21b   :  { %v2876_v9 = vpop.f32.mrb[0].mxu1 }
 0x21c   :  { %v240_v10 = vadd.f32 %v2876_v9, %v2610_v8  ;;  %v234_v11 = vpop.f32.mrb[1].mxu1 }
 0x21d   :  { %v235_v12 = vadd.f32 %v2610_v8, %v234_v11 }
 0x21e   :  { %v254_v29 = vmul.f32 0.25, %v240_v10 }
 0x21f   :  { %v2879_v13 = vpop.f32.mrb[2].mxu1  ;;  %v3661_v14 = vpack.i.bf16 %v240_v10, %v235_v12  ;;  %v3663_v15 = vmul.f32 0.25, %v235_v12 }
 0x220   :  { %v250_v16 = vadd.f32 %v2879_v13, %v2610_v8  ;;  %v244_v17 = vpop.f32.mrb[3].mxu1 }
 0x221   :  { %v245_v18 = vadd.f32 %v2610_v8, %v244_v17  ;;  %3293 = vrot.lane.b32.xlu0 %v3661_v14, %s3498_s19  ;;  %2888 = vmatprep.mubr.msk.f32.mxu1 %vm269_vm1, %v3663_v15 }
 0x222   :  { %v256_v31 = vmul.f32 0.25, %v250_v16 }
 0x223   :  { %v3669_v19 = vpack.i.bf16 %v250_v16, %v245_v18  ;;  %v255_v30 = vmul.f32 0.25, %v245_v18 }
 0x225   :  { %3298 = vrot.lane.b32.xlu1 %v3669_v19, %s3498_s19 }
 0x293   :  { %v3294_v20 = vpop.permute.xlu0 %3293 }
 0x294   :  { %v3296_v21 = vunpack.i.h.bf16 %v3294_v20  ;;  %v3295_v22 = vunpack.i.l.bf16 %v3294_v20 }
 0x296   :  { %v3125_v24 = vpack.c.bf16 %v3296_v21, %v3295_v22 }
 0x297   :  { %v3299_v25 = vpop.permute.xlu1 %3298 }
 0x298   :  { %v3301_v26 = vunpack.i.h.bf16 %v3299_v25  ;;  %v3300_v27 = vunpack.i.l.bf16 %v3299_v25  ;;  %3127 = vmatprep.subr.msk.bf16.mxu1 %vm3675_vm2, %v3125_v24 }
 0x299   :  { %3130 = vmatpush3.bf16.xpose.msk.msra.mxu1 %vm3675_vm2, %v3125_v24 }
 0x29a   :  { %v3131_v28 = vpack.c.bf16 %v3301_v26, %v3300_v27 }
 0x29c   :  { %3133 = vmatprep.subr.msk.bf16.mxu1 %vm3675_vm2, %v3131_v28 }
 0x2a1   :  { %3136 = vmatpush3.bf16.xpose.msk.msra.mxu1 %vm3675_vm2, %v3131_v28 }
 0x2a8   :  { %2889 = vmatmul.mubr.msk.f32.vlgmr.msra.gmra.mrb[4].mxu1 %vm269_vm1, %v254_v29 }
 0x2a9   :  { %2891 = vmatprep.mubr.msk.f32.mxu1 %vm269_vm1, %v255_v30 }
 0x2ac   :  { %2892 = vmatmul.mubr.msk.f32.gmra.mrb[6].mxu1 %vm269_vm1, %v256_v31 }
 0x37b   :  { %v2890_v34 = vpop.f32.mrb[4].mxu1 }
 0x37c   :  { %v362_v35 = vadd.f32 %v2890_v34, %v3693_v32  ;;  %v356_v36 = vpop.f32.mrb[5].mxu1 }
 0x37d   :  { %v357_v37 = vadd.f32 %v356_v36, %v3698_v33 }
 0x37e   :  { %v378_v39 = vsel %vm67_vm0, %v362_v35, -inf }
 0x37f   :  { %379 = vmax.xlane.f32.xlu0 %v378_v39  ;;  %v2893_v41 = vpop.f32.mrb[6].mxu1  ;;  %v375_v42 = vsel %vm67_vm0, %v357_v37, -inf }
 0x380   :  { %v372_v43 = vadd.f32 %v2893_v41, %v3705_v38  ;;  %v366_v44 = vpop.f32.mrb[7].mxu1  ;;  %376 = vmax.xlane.f32.xlu1 %v375_v42 }
 0x381   :  { %v367_v45 = vadd.f32 %v366_v44, %v3711_v40 }
 0x382   :  { %v384_v46 = vsel %vm67_vm0, %v372_v43, -inf }
 0x383   :  { %v381_v47 = vsel %vm67_vm0, %v367_v45, -inf }
 0x384   :  { %382 = vmax.xlane.f32.xlu0 %v381_v47  ;;  %385 = vmax.xlane.f32.xlu1 %v384_v46 }
 0x40c   :  { %v380_v48 = vpop.xlane.xlu0 %379 }
 0x40d   :  { %v388_v49 = vsub.f32 %v362_v35, %v380_v48  ;;  %v377_v50 = vpop.xlane.xlu1 %376 }
 0x40e   :  { %v387_v51 = vsub.f32 %v357_v37, %v377_v50 }
 0x40f   :  { %v393_v52 = vmul.f32 1.442695, %v388_v49 }
 0x410   :  { %v391_v53 = vmul.f32 1.442695, %v387_v51 }
 0x411   :  { %3380 = vpow2.f32 %v393_v52  ;;  %v383_v58 = vpop.xlane.xlu0 %382  ;;  %v386_v62 = vpop.xlane.xlu1 %385 }
 0x412   :  { %3382 = vpow2.f32 %v391_v53  ;;  %v389_v59 = vsub.f32 %v367_v45, %v383_v58  ;;  %v390_v63 = vsub.f32 %v372_v43, %v386_v62 }
 0x414   :  { %v395_v60 = vmul.f32 1.442695, %v389_v59  ;;  %v397_v0 = vmul.f32 1.442695, %v390_v63 }
 0x416   :  { %3384 = vpow2.f32 %v395_v60 }
 0x417   :  { %3386 = vpow2.f32 %v397_v0 }
 0x41b   :  { %v3381_v54 = vpop.eup %3380 }
 0x41c   :  { %v3383_v55 = vpop.eup %3382  ;;  %v402_v56 = vsel %vm67_vm0, %v3381_v54, 0.0 }
 0x41d   :  { %403 = vadd.xlane.f32.xlu1 %v402_v56  ;;  %v399_v57 = vsel %vm67_vm0, %v3383_v55, 0.0 }
 0x41e   :  { %400 = vadd.xlane.f32.xlu0 %v399_v57 }
 0x420   :  { %v3385_v1 = vpop.eup %3384 }
 0x421   :  { %v405_v2 = vsel %vm67_vm0, %v3385_v1, 0.0  ;;  %v3387_v4 = vpop.eup %3386 }
 0x422   :  { %v408_v6 = vsel %vm67_vm0, %v3387_v4, 0.0 }
 0x42e   :  { %3308 = vrot.lane.b32.xlu1 %v3669_v19, %s3499_s27 }
 0x432   :  { %3313 = vrot.lane.b32.xlu1 %v3661_v14, %s3500_s28 }
 0x434   :  { %3303 = vrot.lane.b32.xlu0 %v3661_v14, %s3499_s27 }
 0x436   :  { %3318 = vrot.lane.b32.xlu1 %v3669_v19, %s3500_s28 }
 0x453   :  { %406 = vadd.xlane.f32.xlu0 %v405_v2 }
 0x45a   :  { %409 = vadd.xlane.f32.xlu1 %v408_v6 }
 0x469   :  { %528 = vrot.lane.b32.xlu0 %v3663_v15, %s3501_s29 }
 0x46b   :  { %530 = vrot.lane.b32.xlu1 %v254_v29, %s3501_s29 }
 0x46d   :  { %532 = vrot.lane.b32.xlu0 %v255_v30, %s3501_s29 }
 0x46f   :  { %534 = vrot.lane.b32.xlu1 %v256_v31, %s3501_s29 }
 0x4aa   :  { %v404_v8 = vpop.xlane.xlu1 %403 }
 0x4ab   :  { %v401_v9 = vpop.xlane.xlu0 %400 }
 0x4ac   :  { %3388 = vrcp.f32 %v401_v9 }
 0x4ad   :  { %3390 = vrcp.f32 %v404_v8 }
 0x4ae   :  { %v3309_v10 = vpop.permute.xlu1 %3308 }
 0x4af   :  { %v3304_v11 = vpop.permute.xlu0 %3303  ;;  %v3311_v12 = vunpack.i.h.bf16 %v3309_v10  ;;  %v3310_v13 = vunpack.i.l.bf16 %v3309_v10 }
 0x4b0   :  { %v3306_v16 = vunpack.i.h.bf16 %v3304_v11  ;;  %v3305_v17 = vunpack.i.l.bf16 %v3304_v11 }
 0x4b1   :  { %v3141_v21 = vpack.c.bf16 %v3311_v12, %v3310_v13 }
 0x4b2   :  { %v3314_v18 = vpop.permute.xlu1 %3313  ;;  %v3137_v20 = vpack.c.bf16 %v3306_v16, %v3305_v17 }
 0x4b3   :  { %v3316_v15 = vunpack.i.h.bf16 %v3314_v18  ;;  %v3315_v22 = vunpack.i.l.bf16 %v3314_v18 }
 0x4b4   :  { %3138 = vmatprep.subr.bf16.mxu0 %v3137_v20 }
 0x4b5   :  { %3140 = vmatpush3.bf16.msra.mxu0 %v3137_v20  ;;  %v3145_v27 = vpack.c.bf16 %v3316_v15, %v3315_v22 }
 0x4b6   :  { %v3389_v24 = vpop.eup %3388  ;;  %3142 = vmatprep.subr.bf16.mxu0 %v3141_v21  ;;  %v3319_v28 = vpop.permute.xlu1 %3318 }
 0x4b7   :  { %v3391_v25 = vpop.eup %3390  ;;  %v415_v26 = vmul.f32 %v3389_v24, %v3383_v55  ;;  %v3321_v30 = vunpack.i.h.bf16 %v3319_v28  ;;  %v3320_v31 = vunpack.i.l.bf16 %v3319_v28 }
 0x4b8   :  { %v416_v29 = vmul.f32 %v3391_v25, %v3381_v54 }
 0x4b9   :  { %3144 = vmatpush3.bf16.msra.mxu0 %v3141_v21  ;;  %2902 = vmatprep.mubr.msk.f32.mxu0 %vm67_vm0, %v415_v26  ;;  %v3151_v34 = vpack.c.bf16 %v3321_v30, %v3320_v31 }
 0x4ba   :  { %3147 = vmatprep.subr.msk.bf16.mxu0 %vm3675_vm2, %v3145_v27 }
 0x4bc   :  { %2903 = vmatmul.mubr.msk.f32.vlgmr.msra.gmra.mrb[0].mxu0 %vm67_vm0, %v416_v29 }
 0x4c2   :  { %3150 = vmatpush3.bf16.xpose.msk.msra.mxu0 %vm3675_vm2, %v3145_v27 }
 0x4c3   :  { %3153 = vmatprep.subr.msk.bf16.mxu0 %vm3675_vm2, %v3151_v34 }
 0x4ca   :  { %3156 = vmatpush3.bf16.xpose.msk.msra.mxu0 %vm3675_vm2, %v3151_v34 }
 0x4e0   :  { %v407_v35 = vpop.xlane.xlu0 %406 }
 0x4e1   :  { %3392 = vrcp.f32 %v407_v35 }
 0x4e4   :  { %v529_v42 = vpop.permute.xlu0 %528 }
 0x4e7   :  { %v410_v36 = vpop.xlane.xlu1 %409 }
 0x4e8   :  { %3394 = vrcp.f32 %v410_v36  ;;  %v533_v45 = vpop.permute.xlu0 %532 }
 0x4eb   :  { %v3393_v37 = vpop.eup %3392  ;;  %v531_v44 = vpop.permute.xlu1 %530 }
 0x4ec   :  { %v417_v39 = vmul.f32 %v3393_v37, %v3385_v1 }
 0x4ee   :  { %2905 = vmatprep.mubr.msk.f32.mxu0 %vm67_vm0, %v417_v39 }
 0x4ef   :  { %v535_v46 = vpop.permute.xlu1 %534 }
 0x4f2   :  { %v3395_v41 = vpop.eup %3394 }
 0x4f3   :  { %v418_v43 = vmul.f32 %v3395_v41, %v3387_v4 }
 0x4f5   :  { %2906 = vmatmul.mubr.msk.f32.gmra.mrb[2].mxu0 %vm67_vm0, %v418_v43 }
 0x4f6   :  { %2916 = vmatprep.mubr.msk.f32.mxu0 %vm269_vm1, %v529_v42 }
 0x4f9   :  { %2917 = vmatmul.mubr.msk.f32.vlgmr.msra.gmra.mrb[4].mxu0 %vm269_vm1, %v531_v44  ;;  %v818_v44 = vld [vmem:[%s4194_s8] sm:$0xff] }
 0x4fa   :  { %2919 = vmatprep.mubr.msk.f32.mxu0 %vm269_vm1, %v533_v45  ;;  %v819_v45 = vld [vmem:[%s4194_s8 + $0x8] sm:$0xff] }
 0x4fd   :  { %2920 = vmatmul.mubr.msk.f32.gmra.mrb[6].mxu0 %vm269_vm1, %v535_v46  ;;  %v3165_v46 = vpack.c.bf16 %v819_v45, %v818_v44  ;;  %v983_v45 = vlaneseq }
 0x58f   :  { %v3751_v47 = vpop.f32.mrb[0].mxu0 }
 0x590   :  { %v3753_v48 = vpop.f32.mrb[1].mxu0 }
 0x5c8   :  { %v3755_v49 = vpop.f32.mrb[2].mxu0 }
 0x5c9   :  { %v3757_v50 = vpop.f32.mrb[3].mxu0 }
 0x5cc   :  { %v2918_v51 = vpop.f32.mrb[4].mxu0 }
 0x5cd   :  { %v632_v52 = vadd.f32 %v2918_v51, %v3693_v32  ;;  %v626_v53 = vpop.f32.mrb[5].mxu0  ;;  %v820_v51 = vld [vmem:[%s4194_s8 + $0x10] sm:$0xff] }
 0x5ce   :  { %v627_v54 = vadd.f32 %v626_v53, %v3698_v33 }
 0x5cf   :  { %v648_v55 = vsel %vm67_vm0, %v632_v52, -inf }
 0x5d0   :  { %649 = vmax.xlane.f32.xlu1 %v648_v55  ;;  %v2921_v56 = vpop.f32.mrb[6].mxu0  ;;  %v645_v57 = vsel %vm67_vm0, %v627_v54, -inf }
 0x5d1   :  { %v636_v58 = vpop.f32.mrb[7].mxu0  ;;  %646 = vmax.xlane.f32.xlu0 %v645_v57  ;;  %v642_v60 = vadd.f32 %v2921_v56, %v3705_v38 }
 0x5d2   :  { %v637_v59 = vadd.f32 %v636_v58, %v3711_v40 }
 0x5d3   :  { %v654_v32 = vsel %vm67_vm0, %v642_v60, -inf }
 0x5d4   :  { %v651_v62 = vsel %vm67_vm0, %v637_v59, -inf }
 0x5d5   :  { %652 = vmax.xlane.f32.xlu0 %v651_v62 }
 0x5d9   :  { %655 = vmax.xlane.f32.xlu0 %v654_v32 }
 0x65d   :  { %v650_v63 = vpop.xlane.xlu1 %649 }
 0x65e   :  { %v658_v33 = vsub.f32 %v632_v52, %v650_v63  ;;  %v647_v0 = vpop.xlane.xlu0 %646  ;;  %v821_v52 = vld [vmem:[%s4194_s8 + $0x18] sm:$0xff] }
 0x65f   :  { %v657_v1 = vsub.f32 %v627_v54, %v647_v0  ;;  %v3169_v53 = vpack.c.bf16 %v821_v52, %v820_v51 }
 0x660   :  { %v663_v2 = vmul.f32 1.442695, %v658_v33 }
 0x661   :  { %v661_v4 = vmul.f32 1.442695, %v657_v1 }
 0x662   :  { %3396 = vpow2.f32 %v663_v2  ;;  %v653_v6 = vpop.xlane.xlu0 %652 }
 0x663   :  { %3398 = vpow2.f32 %v661_v4  ;;  %v659_v8 = vsub.f32 %v637_v59, %v653_v6 }
 0x665   :  { %v665_v9 = vmul.f32 1.442695, %v659_v8 }
 0x666   :  { %v656_v40 = vpop.xlane.xlu0 %655 }
 0x667   :  { %3400 = vpow2.f32 %v665_v9  ;;  %v660_v38 = vsub.f32 %v642_v60, %v656_v40 }
 0x669   :  { %v667_v10 = vmul.f32 1.442695, %v660_v38 }
 0x66b   :  { %3402 = vpow2.f32 %v667_v10 }
 0x66c   :  { %v3397_v11 = vpop.eup %3396 }
 0x66d   :  { %v3399_v12 = vpop.eup %3398  ;;  %v672_v13 = vsel %vm67_vm0, %v3397_v11, 0.0 }
 0x66e   :  { %673 = vadd.xlane.f32.xlu1 %v672_v13  ;;  %v669_v16 = vsel %vm67_vm0, %v3399_v12, 0.0 }
 0x66f   :  { %670 = vadd.xlane.f32.xlu0 %v669_v16 }
 0x671   :  { %v3401_v17 = vpop.eup %3400 }
 0x672   :  { %v675_v18 = vsel %vm67_vm0, %v3401_v17, 0.0 }
 0x673   :  { %676 = vadd.xlane.f32.xlu0 %v675_v18 }
 0x675   :  { %v3403_v20 = vpop.eup %3402 }
 0x676   :  { %v678_v21 = vsel %vm67_vm0, %v3403_v20, 0.0 }
 0x677   :  { %679 = vadd.xlane.f32.xlu1 %v678_v21 }
 0x688   :  { %3328 = vrot.lane.b32.xlu1 %v3669_v19, %s3502_s30 }
 0x689   :  { %3323 = vrot.lane.b32.xlu0 %v3661_v14, %s3502_s30 }
 0x6fb   :  { %v674_v22 = vpop.xlane.xlu1 %673 }
 0x6fc   :  { %v671_v15 = vpop.xlane.xlu0 %670 }
 0x6fd   :  { %3404 = vrcp.f32 %v671_v15 }
 0x6fe   :  { %3406 = vrcp.f32 %v674_v22 }
 0x700   :  { %v677_v24 = vpop.xlane.xlu0 %676 }
 0x701   :  { %3408 = vrcp.f32 %v677_v24 }
 0x704   :  { %v680_v25 = vpop.xlane.xlu1 %679  ;;  %v3324_v26 = vpop.permute.xlu0 %3323 }
 0x705   :  { %v3326_v27 = vunpack.i.h.bf16 %v3324_v26  ;;  %v3325_v28 = vunpack.i.l.bf16 %v3324_v26  ;;  %3410 = vrcp.f32 %v680_v25 }
 0x707   :  { %v3405_v29 = vpop.eup %3404  ;;  %v3157_v30 = vpack.c.bf16 %v3326_v27, %v3325_v28 }
 0x708   :  { %v3329_v31 = vpop.permute.xlu1 %3328  ;;  %v685_v34 = vmul.f32 %v3405_v29, %v3399_v12  ;;  %v3407_v36 = vpop.eup %3406 }
 0x709   :  { %v3331_v35 = vunpack.i.h.bf16 %v3329_v31  ;;  %v3330_v19 = vunpack.i.l.bf16 %v3329_v31  ;;  %3158 = vmatprep.subr.bf16.mxu1 %v3157_v30  ;;  %v686_v39 = vmul.f32 %v3407_v36, %v3397_v11 }
 0x70a   :  { %3160 = vmatpush3.bf16.msra.mxu1 %v3157_v30  ;;  %2930 = vmatprep.mubr.msk.f32.mxu1 %vm67_vm0, %v685_v34 }
 0x70b   :  { %v3161_v14 = vpack.c.bf16 %v3331_v35, %v3330_v19  ;;  %v3409_v37 = vpop.eup %3408  ;;  %v999_v19 = vld [vmem:[%s4196_s11] sm:$0xff] }
 0x70c   :  { %v687_v42 = vmul.f32 %v3409_v37, %v3401_v17  ;;  %v1001_v37 = vld [vmem:[%s4196_s11 + $0x10] sm:$0xff] }
 0x70d   :  { %3162 = vmatprep.subr.bf16.mxu1 %v3161_v14 }
 0x70e   :  { %3164 = vmatpush3.bf16.msra.mxu1 %v3161_v14  ;;  %v1000_v14 = vld [vmem:[%s4196_s11 + $0x8] sm:$0xff] }
 0x70f   :  { %v3411_v41 = vpop.eup %3410  ;;  %3166 = vmatprep.subr.bf16.mxu1 %v3165_v46  ;;  %v3173_v36 = vpack.c.bf16 %v1000_v14, %v999_v19 }
 0x710   :  { %v688_v43 = vmul.f32 %v3411_v41, %v3403_v20 }
 0x711   :  { %2931 = vmatmul.mubr.msk.f32.vlgmr.msra.gmra.mrb[8].mxu1 %vm67_vm0, %v686_v39  ;;  %3174 = vmatprep.subr.bf16.mxu0 %v3173_v36  ;;  %v1002_v39 = vld [vmem:[%s4196_s11 + $0x18] sm:$0xff] }
 0x712   :  { %2933 = vmatprep.mubr.msk.f32.mxu1 %vm67_vm0, %v687_v42  ;;  %3168 = vmatpush3.bf16.msra.mxu1 %v3165_v46  ;;  %v3177_v41 = vpack.c.bf16 %v1002_v39, %v1001_v37 }
 0x713   :  { %3170 = vmatprep.subr.bf16.mxu1 %v3169_v53  ;;  %3176 = vmatpush3.bf16.msra.mxu0 %v3173_v36 }
 0x714   :  { %3178 = vmatprep.subr.bf16.mxu0 %v3177_v41 }
 0x715   :  { %2934 = vmatmul.mubr.msk.f32.gmra.mrb[10].mxu1 %vm67_vm0, %v688_v43 }
 0x716   :  { %3172 = vmatpush3.bf16.msra.mxu1 %v3169_v53 }
 0x717   :  { %3180 = vmatpush3.bf16.msra.mxu0 %v3177_v41 }
 0x7e4   :  { %v2932_v54 = vpop.f32.mrb[8].mxu1 }
 0x7e5   :  { %v779_v55 = vpop.f32.mrb[9].mxu1 }
 0x7e6   :  { %802 = vrot.lane.b32.xlu1 %v779_v55, %s3503_s1 }
 0x7e8   :  { %v2935_v56 = vpop.f32.mrb[10].mxu1 }
 0x7e9   :  { %v789_v57 = vpop.f32.mrb[11].mxu1 }
 0x7ea   :  { %804 = vrot.lane.b32.xlu1 %v2932_v54, %s3503_s1  ;;  %806 = vrot.lane.b32.xlu0 %v789_v57, %s3503_s1  ;;  %v984_v54 = vshrl.u32 %v983_v45, 7 }
 0x7ee   :  { %808 = vrot.lane.b32.xlu1 %v2935_v56, %s3503_s1 }
 0x858   :  { %v803_v58 = vpop.permute.xlu1 %802 }
 0x859   :  { %v814_v59 = vsel %vm269_vm1, %v3753_v48, %v803_v58  ;;  %v2639_v48 = vld [vmem:[%s4195_s9] ss:$0 sm:$0xff]  ;;  %v3834_v58 = vsub.s32 0, %v984_v54 }
 0x85a   :  { %2944 = vmatprep.mubr.msk.f32.mxu1 %vm67_vm0, %v814_v59 }
 0x85c   :  { %v805_v60 = vpop.permute.xlu1 %804  ;;  %v807_v62 = vpop.permute.xlu0 %806 }
 0x85d   :  { %v815_v32 = vsel %vm269_vm1, %v3751_v47, %v805_v60  ;;  %v816_v63 = vsel %vm269_vm1, %v3757_v50, %v807_v62  ;;  %v926_v60 = vld [vmem:[%s4197_s10] sm:$0x3] }
 0x85e   :  { %2945 = vmatmul.mubr.msk.f32.vlgmr.msra.gmra.mrb[12].mxu1 %vm67_vm0, %v815_v32  ;;  %v3839_v32 = vsub.s32 1, %v984_v54 }
 0x85f   :  { %2947 = vmatprep.mubr.msk.f32.mxu1 %vm67_vm0, %v816_v63  ;;  %v986_v63 = vrot.slane %v926_v60, %v3834_v58 }
 0x860   :  { %v809_v33 = vpop.permute.xlu1 %808 }
 0x861   :  { %v817_v0 = vsel %vm269_vm1, %v3755_v49, %v809_v33 }
 0x862   :  { %2948 = vmatmul.mubr.msk.f32.gmra.mrb[14].mxu1 %vm67_vm0, %v817_v0 }
 0x931   :  { %v2946_v1 = vpop.f32.mrb[12].mxu1 }
 0x932   :  { %v913_v2 = vadd.f32 %v2946_v1, %v2639_v48  ;;  %v907_v47 = vpop.f32.mrb[13].mxu1 }
 0x933   :  { %v908_v4 = vadd.f32 %v2639_v48, %v907_v47 }
 0x934   :  { %v928_v50 = vadd.f32 %v913_v2, %v3646_v3  ;;  %v994_v2 = vrot.slane %v926_v60, %v3839_v32 }
 0x935   :  { %v2949_v6 = vpop.f32.mrb[14].mxu1  ;;  %v927_v8 = vadd.f32 %v908_v4, %v3642_v61 }
 0x936   :  { %v917_v9 = vpop.f32.mrb[15].mxu1  ;;  %v934_v40 = vsel %vm67_vm0, %v928_v50, 0.0  ;;  %v923_v38 = vadd.f32 %v2949_v6, %v2639_v48 }
 0x937   :  { %v918_v49 = vadd.f32 %v2639_v48, %v917_v9  ;;  %935 = vadd.xlane.f32.xlu1 %v934_v40  ;;  %v931_v10 = vsel %vm67_vm0, %v927_v8, 0.0 }
 0x938   :  { %932 = vadd.xlane.f32.xlu0 %v931_v10  ;;  %v930_v13 = vadd.f32 %v923_v38, %v3654_v7 }
 0x939   :  { %v929_v11 = vadd.f32 %v918_v49, %v3648_v5 }
 0x93a   :  { %v940_v3 = vsel %vm67_vm0, %v930_v13, 0.0 }
 0x93b   :  { %v937_v12 = vsel %vm67_vm0, %v929_v11, 0.0 }
 0x93c   :  { %938 = vadd.xlane.f32.xlu0 %v937_v12 }
 0x940   :  { %941 = vadd.xlane.f32.xlu0 %v940_v3  ;;  %v1144_v3 = vld [vmem:[%s4198_s13 + $0x8] sm:$0xff] }
 0x9c4   :  { %v936_v61 = vpop.xlane.xlu1 %935 }
 0x9c5   :  { %v944_v16 = vmul.f32 0.03125, %v936_v61  ;;  %v933_v17 = vpop.xlane.xlu0 %932 }
 0x9c6   :  { %v943_v18 = vmul.f32 0.03125, %v933_v17  ;;  %v1146_v17 = vld [vmem:[%s4198_s13 + $0x18] sm:$0xff] }
 0x9c7   :  { %v948_v20 = vsub.f32 %v928_v50, %v944_v16  ;;  %v1145_v16 = vld [vmem:[%s4198_s13 + $0x10] sm:$0xff] }
 0x9c8   :  { %v947_v21 = vsub.f32 %v927_v8, %v943_v18  ;;  %v3185_v18 = vpack.c.bf16 %v1146_v17, %v1145_v16 }
 0x9c9   :  { %v939_v15 = vpop.xlane.xlu0 %938  ;;  %v952_v22 = vmul.f32 %v948_v20, %v948_v20 }
 0x9ca   :  { %v945_v24 = vmul.f32 0.03125, %v939_v15  ;;  %v951_v25 = vmul.f32 %v947_v21, %v947_v21 }
 0x9cb   :  { %v958_v5 = vsel %vm67_vm0, %v952_v22, 0.0  ;;  %v1149_v22 = vld [vmem:[%s4198_s13 + $0x30] sm:$0xff] }
 0x9cc   :  { %v949_v26 = vsub.f32 %v929_v11, %v945_v24  ;;  %959 = vadd.xlane.f32.xlu1 %v958_v5  ;;  %v955_v7 = vsel %vm67_vm0, %v951_v25, 0.0  ;;  %v1150_v24 = vld [vmem:[%s4198_s13 + $0x38] sm:$0xff]  ;;  %v2644_v5 = vld [vmem:[%s4199_s12] ss:$0 sm:$0xff] }
 0x9cd   :  { %956 = vadd.xlane.f32.xlu0 %v955_v7  ;;  %v942_v27 = vpop.xlane.xlu0 %941  ;;  %v3193_v25 = vpack.c.bf16 %v1150_v24, %v1149_v22 }
 0x9ce   :  { %v946_v28 = vmul.f32 0.03125, %v942_v27  ;;  %v953_v29 = vmul.f32 %v949_v26, %v949_v26 }
 0x9d0   :  { %v950_v30 = vsub.f32 %v930_v13, %v946_v28  ;;  %v961_v31 = vsel %vm67_vm0, %v953_v29, 0.0  ;;  %v1143_v13 = vld [vmem:[%s4198_s13] sm:$0xff] }
 0x9d1   :  { %962 = vadd.xlane.f32.xlu0 %v961_v31  ;;  %v3181_v61 = vpack.c.bf16 %v1144_v3, %v1143_v13  ;;  %v2649_v13 = vld [vmem:[%s4200_s14] ss:$0 sm:$0xff] }
 0x9d2   :  { %v954_v34 = vmul.f32 %v950_v30, %v950_v30 }
 0x9d3   :  { %3182 = vmatprep.subr.bf16.mxu1 %v3181_v61 }
 0x9d4   :  { %v964_v35 = vsel %vm67_vm0, %v954_v34, 0.0  ;;  %3184 = vmatpush3.bf16.msra.mxu1 %v3181_v61 }
 0x9d5   :  { %965 = vadd.xlane.f32.xlu1 %v964_v35  ;;  %3186 = vmatprep.subr.bf16.mxu1 %v3185_v18 }
 0x9d8   :  { %3188 = vmatpush3.bf16.msra.mxu1 %v3185_v18 }
 0xa59   :  { %v960_v42 = vpop.xlane.xlu1 %959 }
 0xa5a   :  { %v968_v43 = vmul.f32 0.03125, %v960_v42  ;;  %v957_v44 = vpop.xlane.xlu0 %956 }
 0xa5b   :  { %v967_v46 = vmul.f32 0.03125, %v957_v44 }
 0xa5c   :  { %v972_v51 = vadd.f32 1e-05, %v968_v43 }
 0xa5d   :  { %v971_v52 = vadd.f32 1e-05, %v967_v46 }
 0xa5e   :  { %3412 = vrsqrt.f32 %v972_v51  ;;  %v963_v53 = vpop.xlane.xlu0 %962 }
 0xa5f   :  { %3414 = vrsqrt.f32 %v971_v52  ;;  %v969_v55 = vmul.f32 0.03125, %v963_v53 }
 0xa61   :  { %v973_v56 = vadd.f32 1e-05, %v969_v55 }
 0xa62   :  { %v966_v57 = vpop.xlane.xlu1 %965 }
 0xa63   :  { %3416 = vrsqrt.f32 %v973_v56  ;;  %v970_v59 = vmul.f32 0.03125, %v966_v57 }
 0xa65   :  { %v974_v62 = vadd.f32 1e-05, %v970_v59 }
 0xa67   :  { %3418 = vrsqrt.f32 %v974_v62 }
 0xa68   :  { %v3413_v33 = vpop.eup %3412 }
 0xa69   :  { %v3415_v0 = vpop.eup %3414  ;;  %v980_v48 = vmul.f32 %v3413_v33, %v948_v20  ;;  %v1147_v20 = vld [vmem:[%s4198_s13 + $0x20] sm:$0xff] }
 0xa6a   :  { %v979_v1 = vmul.f32 %v3415_v0, %v947_v21  ;;  %v1148_v21 = vld [vmem:[%s4198_s13 + $0x28] sm:$0xff] }
 0xa6b   :  { %v988_v47 = vmul.f32 %v986_v63, %v980_v48  ;;  %v3189_v15 = vpack.c.bf16 %v1148_v21, %v1147_v20 }
 0xa6c   :  { %v987_v4 = vmul.f32 %v986_v63, %v979_v1 }
 0xa6d   :  { %v3417_v50 = vpop.eup %3416  ;;  %v3845_v9 = vadd.f32 %v994_v2, %v988_v47  ;;  %3190 = vmatprep.subr.bf16.mxu1 %v3189_v15 }
 0xa6e   :  { %v3843_v6 = vadd.f32 %v994_v2, %v987_v4  ;;  %v981_v8 = vmul.f32 %v3417_v50, %v949_v26  ;;  %3192 = vmatpush3.bf16.msra.mxu1 %v3189_v15 }
 0xa6f   :  { %3194 = vmatprep.subr.bf16.mxu1 %v3193_v25 }
 0xa70   :  { %2958 = vmatprep.mubr.msk.f32.mxu0 %vm67_vm0, %v3843_v6  ;;  %v989_v40 = vmul.f32 %v986_v63, %v981_v8 }
 0xa71   :  { %v3419_v38 = vpop.eup %3418  ;;  %2959 = vmatmul.mubr.msk.f32.vlgmr.msra.gmra.mrb[8].mxu0 %vm67_vm0, %v3845_v9 }
 0xa72   :  { %v3851_v49 = vadd.f32 %v994_v2, %v989_v40  ;;  %v982_v10 = vmul.f32 %v3419_v38, %v950_v30  ;;  %3196 = vmatpush3.bf16.msra.mxu1 %v3193_v25 }
 0xa74   :  { %2961 = vmatprep.mubr.msk.f32.mxu0 %vm67_vm0, %v3851_v49  ;;  %v990_v11 = vmul.f32 %v986_v63, %v982_v10 }
 0xa76   :  { %v3855_v12 = vadd.f32 %v994_v2, %v990_v11 }
 0xa78   :  { %2962 = vmatmul.mubr.msk.f32.gmra.mrb[10].mxu0 %vm67_vm0, %v3855_v12 }
 0xb44   :  { %v2960_v26 = vpop.f32.mrb[8].mxu0 }
 0xb45   :  { %v1094_v7 = vadd.f32 %v2960_v26, %v2644_v5  ;;  %v1088_v27 = vpop.f32.mrb[9].mxu0 }
 0xb46   :  { %v1089_v28 = vadd.f32 %v2644_v5, %v1088_v27 }
 0xb47   :  { %v1108_v29 = vmul.f32 %v1094_v7, %v1094_v7 }
 0xb48   :  { %v1107_v30 = vmul.f32 %v1089_v28, %v1089_v28 }
 0xb49   :  { %v1112_v31 = vmul.f32 %v1108_v29, %v1094_v7 }
 0xb4a   :  { %v1111_v34 = vmul.f32 %v1107_v30, %v1089_v28 }
 0xb4b   :  { %v1116_v35 = vmul.f32 0.044715, %v1112_v31  ;;  %v2963_v19 = vpop.f32.mrb[10].mxu0 }
 0xb4c   :  { %v1115_v14 = vmul.f32 0.044715, %v1111_v34  ;;  %v1104_v36 = vadd.f32 %v2963_v19, %v2644_v5  ;;  %v1098_v37 = vpop.f32.mrb[11].mxu0 }
 0xb4d   :  { %v1120_v39 = vadd.f32 %v1116_v35, %v1094_v7  ;;  %v1099_v41 = vadd.f32 %v2644_v5, %v1098_v37 }
 0xb4e   :  { %v1119_v42 = vadd.f32 %v1115_v14, %v1089_v28  ;;  %v1110_v43 = vmul.f32 %v1104_v36, %v1104_v36 }
 0xb4f   :  { %v1124_v44 = vmul.f32 0.7978846, %v1120_v39  ;;  %v1109_v45 = vmul.f32 %v1099_v41, %v1099_v41 }
 0xb50   :  { %v1123_v46 = vmul.f32 0.7978846, %v1119_v42  ;;  %v1114_v51 = vmul.f32 %v1110_v43, %v1104_v36 }
 0xb51   :  { %3420 = vtanh.f32 %v1124_v44  ;;  %v1113_v52 = vmul.f32 %v1109_v45, %v1099_v41 }
 0xb52   :  { %3422 = vtanh.f32 %v1123_v46  ;;  %v1118_v53 = vmul.f32 0.044715, %v1114_v51  ;;  %v2654_v51 = vld [vmem:[%s4189_s6 + $0x20] sm:$0xff] }
 0xb53   :  { %v1117_v54 = vmul.f32 0.044715, %v1113_v52  ;;  %v2655_v52 = vld [vmem:[%s4189_s6 + $0x28] sm:$0xff] }
 0xb54   :  { %v1122_v55 = vadd.f32 %v1118_v53, %v1104_v36  ;;  %v3197_v53 = vpack.c.bf16 %v2655_v52, %v2654_v51  ;;  %v3967_v51 = vld [vmem:[%s4193_s2 + $0x8] sm:$0xff] }
 0xb55   :  { %v1121_v56 = vadd.f32 %v1117_v54, %v1099_v41  ;;  %v2656_v54 = vld [vmem:[%s4189_s6 + $0x30] sm:$0xff] }
 0xb56   :  { %v1126_v57 = vmul.f32 0.7978846, %v1122_v55  ;;  %3198 = vmatprep.subr.bf16.mxu0 %v3197_v53  ;;  %v2657_v55 = vld [vmem:[%s4189_s6 + $0x38] sm:$0xff] }
 0xb57   :  { %v1125_v59 = vmul.f32 0.7978846, %v1121_v56  ;;  %3200 = vmatpush3.bf16.msra.mxu0 %v3197_v53  ;;  %v3201_v56 = vpack.c.bf16 %v2657_v55, %v2656_v54  ;;  %v3973_v54 = vld [vmem:[%s4193_s2] sm:$0xff] }
 0xb58   :  { %3424 = vtanh.f32 %v1126_v57 }
 0xb59   :  { %3426 = vtanh.f32 %v1125_v59  ;;  %3202 = vmatprep.subr.bf16.mxu0 %v3201_v56 }
 0xb5b   :  { %v3421_v60 = vpop.eup %3420  ;;  %3204 = vmatpush3.bf16.msra.mxu0 %v3201_v56 }
 0xb5c   :  { %v3423_v62 = vpop.eup %3422  ;;  %v1132_v63 = vadd.f32 1.0, %v3421_v60 }
 0xb5d   :  { %v1131_v33 = vadd.f32 1.0, %v3423_v62 }
 0xb5e   :  { %v1136_v0 = vmul.f32 0.5, %v1132_v63 }
 0xb5f   :  { %v1135_v48 = vmul.f32 0.5, %v1131_v33 }
 0xb60   :  { %v1140_v47 = vmul.f32 %v1136_v0, %v1094_v7 }
 0xb61   :  { %v1139_v1 = vmul.f32 %v1135_v48, %v1089_v28 }
 0xb62   :  { %v3425_v2 = vpop.eup %3424 }
 0xb63   :  { %v3427_v4 = vpop.eup %3426  ;;  %2980 = vmatprep.mubr.msk.f32.mxu1 %vm1158_vm3, %v1139_v1  ;;  %v1134_v50 = vadd.f32 1.0, %v3425_v2 }
 0xb64   :  { %2981 = vmatmul.mubr.msk.f32.vlgmr.msra.gmra.mrb[16].mxu1 %vm1158_vm3, %v1140_v47  ;;  %v1133_v8 = vadd.f32 1.0, %v3427_v4  ;;  %v1256_v4 = vld [vmem:[%s4201_s15] sm:$0x3] }
 0xb65   :  { %v1138_v40 = vmul.f32 0.5, %v1134_v50 }
 0xb66   :  { %v1137_v38 = vmul.f32 0.5, %v1133_v8  ;;  %v1316_v8 = vrot.slane %v1256_v4, %v3834_v58 }
 0xb67   :  { %v1142_v11 = vmul.f32 %v1138_v40, %v1104_v36 }
 0xb68   :  { %v1141_v10 = vmul.f32 %v1137_v38, %v1099_v41 }
 0xb6a   :  { %2983 = vmatprep.mubr.msk.f32.mxu1 %vm1158_vm3, %v1141_v10 }
 0xb6b   :  { %2984 = vmatmul.mubr.msk.f32.gmra.mrb[18].mxu1 %vm1158_vm3, %v1142_v11 }
 0xc37   :  { %v2982_v3 = vpop.f32.mrb[16].mxu1 }
 0xc38   :  { %v1243_v61 = vadd.f32 %v2982_v3, %v2649_v13  ;;  %v1237_v16 = vpop.f32.mrb[17].mxu1 }
 0xc39   :  { %v1238_v17 = vadd.f32 %v2649_v13, %v1237_v16 }
 0xc3a   :  { %v1258_v18 = vadd.f32 %v1243_v61, %v3845_v9 }
 0xc3b   :  { %v1257_v20 = vadd.f32 %v1238_v17, %v3843_v6 }
 0xc3c   :  { %v1264_v21 = vsel %vm67_vm0, %v1258_v18, 0.0 }
 0xc3d   :  { %1265 = vadd.xlane.f32.xlu1 %v1264_v21  ;;  %v1261_v15 = vsel %vm67_vm0, %v1257_v20, 0.0 }
 0xc3e   :  { %1262 = vadd.xlane.f32.xlu0 %v1261_v15  ;;  %v2985_v22 = vpop.f32.mrb[18].mxu1 }
 0xc3f   :  { %v1253_v24 = vadd.f32 %v2985_v22, %v2649_v13  ;;  %v1247_v25 = vpop.f32.mrb[19].mxu1 }
 0xc40   :  { %v1248_v5 = vadd.f32 %v2649_v13, %v1247_v25  ;;  %v1324_v13 = vrot.slane %v1256_v4, %v3839_v32 }
 0xc41   :  { %v1260_v26 = vadd.f32 %v1253_v24, %v3855_v12 }
 0xc42   :  { %v1259_v7 = vadd.f32 %v1248_v5, %v3851_v49 }
 0xc43   :  { %v1270_v27 = vsel %vm67_vm0, %v1260_v26, 0.0 }
 0xc44   :  { %1271 = vadd.xlane.f32.xlu1 %v1270_v27  ;;  %v1267_v9 = vsel %vm67_vm0, %v1259_v7, 0.0 }
 0xc45   :  { %1268 = vadd.xlane.f32.xlu0 %v1267_v9 }
 0xcca   :  { %v1266_v6 = vpop.xlane.xlu1 %1265 }
 0xccb   :  { %v1274_v28 = vmul.f32 0.03125, %v1266_v6  ;;  %v1263_v29 = vpop.xlane.xlu0 %1262 }
 0xccc   :  { %v1273_v30 = vmul.f32 0.03125, %v1263_v29 }
 0xccd   :  { %v1278_v31 = vsub.f32 %v1258_v18, %v1274_v28 }
 0xcce   :  { %v1277_v34 = vsub.f32 %v1257_v20, %v1273_v30 }
 0xccf   :  { %v1282_v35 = vmul.f32 %v1278_v31, %v1278_v31 }
 0xcd0   :  { %v1281_v19 = vmul.f32 %v1277_v34, %v1277_v34 }
 0xcd1   :  { %v1272_v14 = vpop.xlane.xlu1 %1271  ;;  %v1288_v36 = vsel %vm67_vm0, %v1282_v35, 0.0 }
 0xcd2   :  { %v1276_v12 = vmul.f32 0.03125, %v1272_v14  ;;  %1289 = vadd.xlane.f32.xlu1 %v1288_v36  ;;  %v1269_v49 = vpop.xlane.xlu0 %1268  ;;  %v1285_v37 = vsel %vm67_vm0, %v1281_v19, 0.0 }
 0xcd3   :  { %v1275_v39 = vmul.f32 0.03125, %v1269_v49  ;;  %1286 = vadd.xlane.f32.xlu0 %v1285_v37 }
 0xcd4   :  { %v1280_v41 = vsub.f32 %v1260_v26, %v1276_v12  ;;  %v2659_v26 = vld [vmem:[%s4192_s7 + $0x1] ss:$0 sm:$0xff] }
 0xcd5   :  { %v1279_v42 = vsub.f32 %v1259_v7, %v1275_v39 }
 0xcd6   :  { %v1284_v43 = vmul.f32 %v1280_v41, %v1280_v41 }
 0xcd7   :  { %v1283_v44 = vmul.f32 %v1279_v42, %v1279_v42 }
 0xcd8   :  { %v1294_v45 = vsel %vm67_vm0, %v1284_v43, 0.0 }
 0xcd9   :  { %1295 = vadd.xlane.f32.xlu1 %v1294_v45  ;;  %v1291_v46 = vsel %vm67_vm0, %v1283_v44, 0.0 }
 0xcda   :  { %1292 = vadd.xlane.f32.xlu0 %v1291_v46 }
 0xd5f   :  { %v1290_v57 = vpop.xlane.xlu1 %1289 }
 0xd60   :  { %v1298_v59 = vmul.f32 0.03125, %v1290_v57  ;;  %v1287_v60 = vpop.xlane.xlu0 %1286 }
 0xd61   :  { %v1297_v62 = vmul.f32 0.03125, %v1287_v60  ;;  %v3981_v60 = vld [vmem:[%s4193_s2 + $0x18] sm:$0xff] }
 0xd62   :  { %v1302_v63 = vadd.f32 1e-05, %v1298_v59 }
 0xd63   :  { %v1301_v33 = vadd.f32 1e-05, %v1297_v62 }
 0xd64   :  { %3428 = vrsqrt.f32 %v1302_v63 }
 0xd65   :  { %3430 = vrsqrt.f32 %v1301_v33  ;;  %v3987_v33 = vld [vmem:[%s4193_s2 + $0x10] sm:$0xff] }
 0xd66   :  { %v1296_v0 = vpop.xlane.xlu1 %1295 }
 0xd67   :  { %v1300_v48 = vmul.f32 0.03125, %v1296_v0  ;;  %v1293_v1 = vpop.xlane.xlu0 %1292 }
 0xd68   :  { %v1299_v2 = vmul.f32 0.03125, %v1293_v1 }
 0xd69   :  { %v1304_v47 = vadd.f32 1e-05, %v1300_v48 }
 0xd6a   :  { %v1303_v50 = vadd.f32 1e-05, %v1299_v2 }
 0xd6b   :  { %3432 = vrsqrt.f32 %v1304_v47 }
 0xd6c   :  { %3434 = vrsqrt.f32 %v1303_v50 }
 0xd6e   :  { %v3429_v40 = vpop.eup %3428 }
 0xd6f   :  { %v3431_v38 = vpop.eup %3430  ;;  %v1310_v10 = vmul.f32 %v3429_v40, %v1278_v31 }
 0xd70   :  { %v1309_v11 = vmul.f32 %v3431_v38, %v1277_v34 }
 0xd71   :  { %v1318_v3 = vmul.f32 %v1316_v8, %v1310_v10 }
 0xd72   :  { %v1317_v61 = vmul.f32 %v1316_v8, %v1309_v11 }
 0xd73   :  { %v3924_v18 = vadd.f32 %v1324_v13, %v1318_v3 }
 0xd74   :  { %v3922_v16 = vadd.f32 %v1324_v13, %v1317_v61 }
 0xd75   :  { %v3433_v17 = vpop.eup %3432 }
 0xd76   :  { %v3435_v20 = vpop.eup %3434  ;;  %2994 = vmatprep.mubr.msk.f32.mxu0 %vm67_vm0, %v3922_v16  ;;  %v1312_v21 = vmul.f32 %v3433_v17, %v1280_v41 }
 0xd77   :  { %2995 = vmatmul.mubr.msk.f32.vlgmr.msra.gmra.mrb[12].mxu0 %vm67_vm0, %v3924_v18  ;;  %v1311_v15 = vmul.f32 %v3435_v20, %v1279_v42 }
 0xd78   :  { %v1320_v22 = vmul.f32 %v1316_v8, %v1312_v21 }
 0xd79   :  { %v1319_v24 = vmul.f32 %v1316_v8, %v1311_v15 }
 0xd7a   :  { %v3932_v5 = vadd.f32 %v1324_v13, %v1320_v22 }
 0xd7b   :  { %v3930_v25 = vadd.f32 %v1324_v13, %v1319_v24 }
 0xd7d   :  { %2997 = vmatprep.mubr.msk.f32.mxu0 %vm67_vm0, %v3930_v25 }
 0xd7e   :  { %2998 = vmatmul.mubr.msk.f32.gmra.mrb[14].mxu0 %vm67_vm0, %v3932_v5 }
 0xe4a   :  { %v2996_v7 = vpop.f32.mrb[12].mxu0 }
 0xe4b   :  { %v1426_v27 = vadd.f32 %v2996_v7, %v2659_v26  ;;  %v1420_v9 = vpop.f32.mrb[13].mxu0 }
 0xe4c   :  { %v1421_v6 = vadd.f32 %v2659_v26, %v1420_v9 }
 0xe4d   :  { %v1440_v43 = vmul.f32 0.25, %v1426_v27 }
 0xe4e   :  { %v3941_v28 = vpack.i.bf16 %v1426_v27, %v1421_v6  ;;  %v3943_v29 = vmul.f32 0.25, %v1421_v6 }
 0xe50   :  { %3333 = vrot.lane.b32.xlu0 %v3941_v28, %s3498_s19  ;;  %3008 = vmatprep.mubr.msk.f32.mxu0 %vm269_vm1, %v3943_v29 }
 0xe51   :  { %v2999_v30 = vpop.f32.mrb[14].mxu0 }
 0xe52   :  { %v1436_v31 = vadd.f32 %v2999_v30, %v2659_v26  ;;  %v1430_v34 = vpop.f32.mrb[15].mxu0 }
 0xe53   :  { %v1431_v35 = vadd.f32 %v2659_v26, %v1430_v34 }
 0xe54   :  { %v1442_v45 = vmul.f32 0.25, %v1436_v31 }
 0xe55   :  { %v3949_v19 = vpack.i.bf16 %v1436_v31, %v1431_v35  ;;  %v1441_v44 = vmul.f32 0.25, %v1431_v35 }
 0xe57   :  { %3338 = vrot.lane.b32.xlu1 %v3949_v19, %s3498_s19 }
 0xec2   :  { %v3334_v14 = vpop.permute.xlu0 %3333 }
 0xec3   :  { %v3336_v36 = vunpack.i.h.bf16 %v3334_v14  ;;  %v3335_v12 = vunpack.i.l.bf16 %v3334_v14 }
 0xec5   :  { %v3205_v49 = vpack.c.bf16 %v3336_v36, %v3335_v12 }
 0xec7   :  { %3207 = vmatprep.subr.msk.bf16.mxu0 %vm3675_vm2, %v3205_v49 }
 0xec8   :  { %3210 = vmatpush3.bf16.xpose.msk.msra.mxu0 %vm3675_vm2, %v3205_v49 }
 0xec9   :  { %v3339_v37 = vpop.permute.xlu1 %3338 }
 0xeca   :  { %v3341_v39 = vunpack.i.h.bf16 %v3339_v37  ;;  %v3340_v41 = vunpack.i.l.bf16 %v3339_v37 }
 0xecc   :  { %v3211_v42 = vpack.c.bf16 %v3341_v39, %v3340_v41 }
 0xece   :  { %3213 = vmatprep.subr.msk.bf16.mxu0 %vm3675_vm2, %v3211_v42 }
 0xed0   :  { %3216 = vmatpush3.bf16.xpose.msk.msra.mxu0 %vm3675_vm2, %v3211_v42 }
 0xed7   :  { %3009 = vmatmul.mubr.msk.f32.vlgmr.msra.gmra.mrb[16].mxu0 %vm269_vm1, %v1440_v43 }
 0xed8   :  { %3011 = vmatprep.mubr.msk.f32.mxu0 %vm269_vm1, %v1441_v44 }
 0xedb   :  { %3012 = vmatmul.mubr.msk.f32.gmra.mrb[18].mxu0 %vm269_vm1, %v1442_v45 }
 0xfaa   :  { %v3010_v46 = vpop.f32.mrb[16].mxu0 }
 0xfab   :  { %v1547_v52 = vadd.f32 %v3967_v51, %v3010_v46  ;;  %v1541_v53 = vpop.f32.mrb[17].mxu0 }
 0xfac   :  { %v1542_v55 = vadd.f32 %v3973_v54, %v1541_v53 }
 0xfad   :  { %v1563_v56 = vsel %vm67_vm0, %v1547_v52, -inf }
 0xfae   :  { %1564 = vmax.xlane.f32.xlu0 %v1563_v56  ;;  %v3013_v57 = vpop.f32.mrb[18].mxu0  ;;  %v1560_v59 = vsel %vm67_vm0, %v1542_v55, -inf }
 0xfaf   :  { %v1557_v62 = vadd.f32 %v3981_v60, %v3013_v57  ;;  %v1551_v63 = vpop.f32.mrb[19].mxu0  ;;  %1561 = vmax.xlane.f32.xlu1 %v1560_v59 }
 0xfb0   :  { %v1552_v0 = vadd.f32 %v3987_v33, %v1551_v63 }
 0xfb1   :  { %v1569_v48 = vsel %vm67_vm0, %v1557_v62, -inf }
 0xfb2   :  { %v1566_v1 = vsel %vm67_vm0, %v1552_v0, -inf }
 0xfb3   :  { %1567 = vmax.xlane.f32.xlu0 %v1566_v1  ;;  %1570 = vmax.xlane.f32.xlu1 %v1569_v48 }
0x103b   :  { %v1565_v2 = vpop.xlane.xlu0 %1564 }
0x103c   :  { %v1573_v47 = vsub.f32 %v1547_v52, %v1565_v2  ;;  %v1562_v4 = vpop.xlane.xlu1 %1561 }
0x103d   :  { %v1572_v50 = vsub.f32 %v1542_v55, %v1562_v4 }
0x103e   :  { %v1578_v8 = vmul.f32 1.442695, %v1573_v47 }
0x103f   :  { %v1576_v40 = vmul.f32 1.442695, %v1572_v50 }
0x1040   :  { %3436 = vpow2.f32 %v1578_v8  ;;  %v1568_v3 = vpop.xlane.xlu0 %1567  ;;  %v1571_v20 = vpop.xlane.xlu1 %1570 }
0x1041   :  { %3438 = vpow2.f32 %v1576_v40  ;;  %v1574_v61 = vsub.f32 %v1552_v0, %v1568_v3  ;;  %v1575_v21 = vsub.f32 %v1557_v62, %v1571_v20 }
0x1043   :  { %v1580_v17 = vmul.f32 1.442695, %v1574_v61  ;;  %v1582_v15 = vmul.f32 1.442695, %v1575_v21 }
0x1045   :  { %3440 = vpow2.f32 %v1580_v17 }
0x1046   :  { %3442 = vpow2.f32 %v1582_v15 }
0x104a   :  { %v3437_v38 = vpop.eup %3436 }
0x104b   :  { %v3439_v10 = vpop.eup %3438  ;;  %v1587_v11 = vsel %vm67_vm0, %v3437_v38, 0.0 }
0x104c   :  { %1588 = vadd.xlane.f32.xlu1 %v1587_v11  ;;  %v1584_v13 = vsel %vm67_vm0, %v3439_v10, 0.0 }
0x104d   :  { %1585 = vadd.xlane.f32.xlu0 %v1584_v13 }
0x104f   :  { %v3441_v22 = vpop.eup %3440 }
0x1050   :  { %v1590_v24 = vsel %vm67_vm0, %v3441_v22, 0.0  ;;  %v3443_v26 = vpop.eup %3442 }
0x1051   :  { %v1593_v7 = vsel %vm67_vm0, %v3443_v26, 0.0 }
0x105d   :  { %3348 = vrot.lane.b32.xlu1 %v3949_v19, %s3499_s27 }
0x1061   :  { %3353 = vrot.lane.b32.xlu1 %v3941_v28, %s3500_s28 }
0x1063   :  { %3343 = vrot.lane.b32.xlu0 %v3941_v28, %s3499_s27 }
0x1065   :  { %3358 = vrot.lane.b32.xlu1 %v3949_v19, %s3500_s28 }
0x1082   :  { %1591 = vadd.xlane.f32.xlu0 %v1590_v24 }
0x1089   :  { %1594 = vadd.xlane.f32.xlu1 %v1593_v7 }
0x1098   :  { %1713 = vrot.lane.b32.xlu0 %v3943_v29, %s3501_s29 }
0x109a   :  { %1715 = vrot.lane.b32.xlu1 %v1440_v43, %s3501_s29 }
0x109c   :  { %1717 = vrot.lane.b32.xlu0 %v1441_v44, %s3501_s29 }
0x109e   :  { %1719 = vrot.lane.b32.xlu1 %v1442_v45, %s3501_s29 }
0x10d9   :  { %v1589_v27 = vpop.xlane.xlu1 %1588 }
0x10da   :  { %v1586_v9 = vpop.xlane.xlu0 %1585 }
0x10db   :  { %3444 = vrcp.f32 %v1586_v9 }
0x10dc   :  { %3446 = vrcp.f32 %v1589_v27 }
0x10dd   :  { %v3349_v6 = vpop.permute.xlu1 %3348 }
0x10de   :  { %v3344_v30 = vpop.permute.xlu0 %3343  ;;  %v3351_v31 = vunpack.i.h.bf16 %v3349_v6  ;;  %v3350_v34 = vunpack.i.l.bf16 %v3349_v6 }
0x10df   :  { %v3346_v35 = vunpack.i.h.bf16 %v3344_v30  ;;  %v3345_v14 = vunpack.i.l.bf16 %v3344_v30 }
0x10e0   :  { %v3221_v49 = vpack.c.bf16 %v3351_v31, %v3350_v34 }
0x10e1   :  { %v3217_v36 = vpack.c.bf16 %v3346_v35, %v3345_v14  ;;  %v3354_v12 = vpop.permute.xlu1 %3353 }
0x10e2   :  { %v3356_v29 = vunpack.i.h.bf16 %v3354_v12  ;;  %v3355_v37 = vunpack.i.l.bf16 %v3354_v12 }
0x10e3   :  { %3218 = vmatprep.subr.bf16.mxu1 %v3217_v36 }
0x10e4   :  { %3220 = vmatpush3.bf16.msra.mxu1 %v3217_v36  ;;  %v3225_v43 = vpack.c.bf16 %v3356_v29, %v3355_v37 }
0x10e5   :  { %v3445_v39 = vpop.eup %3444  ;;  %3222 = vmatprep.subr.bf16.mxu1 %v3221_v49  ;;  %v3359_v45 = vpop.permute.xlu1 %3358 }
0x10e6   :  { %v3447_v41 = vpop.eup %3446  ;;  %v1600_v42 = vmul.f32 %v3445_v39, %v3439_v10  ;;  %v3361_v46 = vunpack.i.h.bf16 %v3359_v45  ;;  %v3360_v52 = vunpack.i.l.bf16 %v3359_v45 }
0x10e7   :  { %v1601_v44 = vmul.f32 %v3447_v41, %v3437_v38 }
0x10e8   :  { %3224 = vmatpush3.bf16.msra.mxu1 %v3221_v49  ;;  %3022 = vmatprep.mubr.msk.f32.mxu1 %vm67_vm0, %v1600_v42  ;;  %v3231_v53 = vpack.c.bf16 %v3361_v46, %v3360_v52 }
0x10e9   :  { %3227 = vmatprep.subr.msk.bf16.mxu1 %vm3675_vm2, %v3225_v43 }
0x10eb   :  { %3023 = vmatmul.mubr.msk.f32.vlgmr.msra.gmra.mrb[20].mxu1 %vm67_vm0, %v1601_v44 }
0x10f1   :  { %3230 = vmatpush3.bf16.xpose.msk.msra.mxu1 %vm3675_vm2, %v3225_v43 }
0x10f2   :  { %3233 = vmatprep.subr.msk.bf16.mxu1 %vm3675_vm2, %v3231_v53 }
0x10f9   :  { %3236 = vmatpush3.bf16.xpose.msk.msra.mxu1 %vm3675_vm2, %v3231_v53 }
0x110f   :  { %v1592_v55 = vpop.xlane.xlu0 %1591 }
0x1110   :  { %3448 = vrcp.f32 %v1592_v55 }
0x1113   :  { %v1714_v63 = vpop.permute.xlu0 %1713 }
0x1116   :  { %v1595_v56 = vpop.xlane.xlu1 %1594 }
0x1117   :  { %3450 = vrcp.f32 %v1595_v56  ;;  %v1718_v1 = vpop.permute.xlu0 %1717 }
0x111a   :  { %v3449_v57 = vpop.eup %3448  ;;  %v1716_v48 = vpop.permute.xlu1 %1715 }
0x111b   :  { %v1602_v59 = vmul.f32 %v3449_v57, %v3441_v22 }
0x111d   :  { %3025 = vmatprep.mubr.msk.f32.mxu1 %vm67_vm0, %v1602_v59 }
0x111e   :  { %v1720_v23 = vpop.permute.xlu1 %1719 }
0x1121   :  { %v3451_v62 = vpop.eup %3450 }
0x1122   :  { %v1603_v0 = vmul.f32 %v3451_v62, %v3443_v26 }
0x1124   :  { %3026 = vmatmul.mubr.msk.f32.gmra.mrb[22].mxu1 %vm67_vm0, %v1603_v0 }
0x1125   :  { %3036 = vmatprep.mubr.msk.f32.mxu1 %vm269_vm1, %v1714_v63 }
0x1128   :  { %3037 = vmatmul.mubr.msk.f32.vlgmr.msra.gmra.mrb[24].mxu1 %vm269_vm1, %v1716_v48 }
0x1129   :  { %3039 = vmatprep.mubr.msk.f32.mxu1 %vm269_vm1, %v1718_v1  ;;  %v2688_v1 = vld [vmem:[%s4194_s8 + $0x20] sm:$0xff] }
0x112c   :  { %3040 = vmatmul.mubr.msk.f32.gmra.mrb[26].mxu1 %vm269_vm1, %v1720_v23  ;;  %v2689_v23 = vld [vmem:[%s4194_s8 + $0x28] sm:$0xff] }
0x11be   :  { %v4025_v2 = vpop.f32.mrb[20].mxu1 }
0x11bf   :  { %v4027_v47 = vpop.f32.mrb[21].mxu1 }
0x11f7   :  { %v4029_v4 = vpop.f32.mrb[22].mxu1 }
0x11f8   :  { %v4031_v50 = vpop.f32.mrb[23].mxu1 }
0x11fb   :  { %v3038_v8 = vpop.f32.mrb[24].mxu1 }
0x11fc   :  { %v1817_v40 = vadd.f32 %v3967_v51, %v3038_v8  ;;  %v1811_v38 = vpop.f32.mrb[25].mxu1  ;;  %v3245_v8 = vpack.c.bf16 %v2689_v23, %v2688_v1 }
0x11fd   :  { %v1812_v10 = vadd.f32 %v3973_v54, %v1811_v38  ;;  %v2691_v38 = vld [vmem:[%s4194_s8 + $0x38] sm:$0xff] }
0x11fe   :  { %v1833_v11 = vsel %vm67_vm0, %v1817_v40, -inf }
0x11ff   :  { %1834 = vmax.xlane.f32.xlu1 %v1833_v11  ;;  %v3041_v13 = vpop.f32.mrb[26].mxu1  ;;  %v1830_v3 = vsel %vm67_vm0, %v1812_v10, -inf }
0x1200   :  { %v1821_v61 = vpop.f32.mrb[27].mxu1  ;;  %1831 = vmax.xlane.f32.xlu0 %v1830_v3  ;;  %v1827_v20 = vadd.f32 %v3981_v60, %v3041_v13 }
0x1201   :  { %v1822_v17 = vadd.f32 %v3987_v33, %v1821_v61 }
0x1202   :  { %v1839_v51 = vsel %vm67_vm0, %v1827_v20, -inf }
0x1203   :  { %v1836_v21 = vsel %vm67_vm0, %v1822_v17, -inf }
0x1204   :  { %1837 = vmax.xlane.f32.xlu0 %v1836_v21 }
0x1208   :  { %1840 = vmax.xlane.f32.xlu0 %v1839_v51 }
0x128c   :  { %v1835_v15 = vpop.xlane.xlu1 %1834 }
0x128d   :  { %v1843_v54 = vsub.f32 %v1817_v40, %v1835_v15  ;;  %v1832_v22 = vpop.xlane.xlu0 %1831  ;;  %v2690_v40 = vld [vmem:[%s4194_s8 + $0x30] sm:$0xff] }
0x128e   :  { %v1842_v24 = vsub.f32 %v1812_v10, %v1832_v22  ;;  %v3249_v10 = vpack.c.bf16 %v2691_v38, %v2690_v40 }
0x128f   :  { %v1848_v26 = vmul.f32 1.442695, %v1843_v54 }
0x1290   :  { %v1846_v7 = vmul.f32 1.442695, %v1842_v24 }
0x1291   :  { %3452 = vpow2.f32 %v1848_v26  ;;  %v1838_v27 = vpop.xlane.xlu0 %1837 }
0x1292   :  { %3454 = vpow2.f32 %v1846_v7  ;;  %v1844_v9 = vsub.f32 %v1822_v17, %v1838_v27 }
0x1294   :  { %v1850_v6 = vmul.f32 1.442695, %v1844_v9 }
0x1295   :  { %v1841_v33 = vpop.xlane.xlu0 %1840 }
0x1296   :  { %3456 = vpow2.f32 %v1850_v6  ;;  %v1845_v60 = vsub.f32 %v1827_v20, %v1841_v33 }
0x1298   :  { %v1852_v30 = vmul.f32 1.442695, %v1845_v60 }
0x129a   :  { %3458 = vpow2.f32 %v1852_v30 }
0x129b   :  { %v3453_v31 = vpop.eup %3452 }
0x129c   :  { %v3455_v34 = vpop.eup %3454  ;;  %v1857_v35 = vsel %vm67_vm0, %v3453_v31, 0.0 }
0x129d   :  { %1858 = vadd.xlane.f32.xlu1 %v1857_v35  ;;  %v1854_v14 = vsel %vm67_vm0, %v3455_v34, 0.0 }
0x129e   :  { %1855 = vadd.xlane.f32.xlu0 %v1854_v14 }
0x12a0   :  { %v3457_v36 = vpop.eup %3456 }
0x12a1   :  { %v1860_v12 = vsel %vm67_vm0, %v3457_v36, 0.0 }
0x12a2   :  { %1861 = vadd.xlane.f32.xlu0 %v1860_v12 }
0x12a4   :  { %v3459_v49 = vpop.eup %3458 }
0x12a5   :  { %v1863_v29 = vsel %vm67_vm0, %v3459_v49, 0.0 }
0x12a6   :  { %1864 = vadd.xlane.f32.xlu1 %v1863_v29 }
0x12b7   :  { %3368 = vrot.lane.b32.xlu1 %v3949_v19, %s3502_s30 }
0x12b8   :  { %3363 = vrot.lane.b32.xlu0 %v3941_v28, %s3502_s30 }
0x132a   :  { %v1859_v39 = vpop.xlane.xlu1 %1858 }
0x132b   :  { %v1856_v37 = vpop.xlane.xlu0 %1855 }
0x132c   :  { %3460 = vrcp.f32 %v1856_v37 }
0x132d   :  { %3462 = vrcp.f32 %v1859_v39 }
0x132f   :  { %v1862_v41 = vpop.xlane.xlu0 %1861 }
0x1330   :  { %3464 = vrcp.f32 %v1862_v41 }
0x1333   :  { %v1865_v42 = vpop.xlane.xlu1 %1864  ;;  %v3364_v43 = vpop.permute.xlu0 %3363 }
0x1334   :  { %v3366_v44 = vunpack.i.h.bf16 %v3364_v43  ;;  %v3365_v45 = vunpack.i.l.bf16 %v3364_v43  ;;  %3466 = vrcp.f32 %v1865_v42 }
0x1336   :  { %v3461_v46 = vpop.eup %3460  ;;  %v3237_v52 = vpack.c.bf16 %v3366_v44, %v3365_v45 }
0x1337   :  { %v3369_v53 = vpop.permute.xlu1 %3368  ;;  %v1870_v55 = vmul.f32 %v3461_v46, %v3455_v34  ;;  %v3463_v57 = vpop.eup %3462 }
0x1338   :  { %v3371_v56 = vunpack.i.h.bf16 %v3369_v53  ;;  %v3370_v19 = vunpack.i.l.bf16 %v3369_v53  ;;  %3238 = vmatprep.subr.bf16.mxu0 %v3237_v52  ;;  %v1871_v62 = vmul.f32 %v3463_v57, %v3453_v31  ;;  %v2700_v57 = vld [vmem:[%s4196_s11 + $0x28] sm:$0xff] }
0x1339   :  { %3240 = vmatpush3.bf16.msra.mxu0 %v3237_v52  ;;  %3050 = vmatprep.mubr.msk.f32.mxu0 %vm67_vm0, %v1870_v55 }
0x133a   :  { %v3241_v28 = vpack.c.bf16 %v3371_v56, %v3370_v19  ;;  %v3465_v59 = vpop.eup %3464 }
0x133b   :  { %v1872_v0 = vmul.f32 %v3465_v59, %v3457_v36 }
0x133c   :  { %3242 = vmatprep.subr.bf16.mxu0 %v3241_v28 }
0x133d   :  { %3244 = vmatpush3.bf16.msra.mxu0 %v3241_v28  ;;  %v2699_v28 = vld [vmem:[%s4196_s11 + $0x20] sm:$0xff] }
0x133e   :  { %v3467_v63 = vpop.eup %3466  ;;  %3246 = vmatprep.subr.bf16.mxu0 %v3245_v8  ;;  %v3253_v59 = vpack.c.bf16 %v2700_v57, %v2699_v28 }
0x133f   :  { %v1873_v48 = vmul.f32 %v3467_v63, %v3459_v49  ;;  %v2702_v63 = vld [vmem:[%s4196_s11 + $0x38] sm:$0xff] }
0x1340   :  { %3051 = vmatmul.mubr.msk.f32.vlgmr.msra.gmra.mrb[20].mxu0 %vm67_vm0, %v1871_v62  ;;  %3254 = vmatprep.subr.bf16.mxu1 %v3253_v59  ;;  %v2701_v62 = vld [vmem:[%s4196_s11 + $0x30] sm:$0xff] }
0x1341   :  { %3053 = vmatprep.mubr.msk.f32.mxu0 %vm67_vm0, %v1872_v0  ;;  %3248 = vmatpush3.bf16.msra.mxu0 %v3245_v8  ;;  %v3257_v0 = vpack.c.bf16 %v2702_v63, %v2701_v62 }
0x1342   :  { %3250 = vmatprep.subr.bf16.mxu0 %v3249_v10  ;;  %3256 = vmatpush3.bf16.msra.mxu1 %v3253_v59 }
0x1343   :  { %3258 = vmatprep.subr.bf16.mxu1 %v3257_v0 }
0x1344   :  { %3054 = vmatmul.mubr.msk.f32.gmra.mrb[22].mxu0 %vm67_vm0, %v1873_v48 }
0x1345   :  { %3252 = vmatpush3.bf16.msra.mxu0 %v3249_v10 }
0x1346   :  { %3260 = vmatpush3.bf16.msra.mxu1 %v3257_v0 }
0x1413   :  { %v3052_v11 = vpop.f32.mrb[20].mxu0 }
0x1414   :  { %v1964_v13 = vpop.f32.mrb[21].mxu0 }
0x1415   :  { %1987 = vrot.lane.b32.xlu1 %v1964_v13, %s3503_s1 }
0x1417   :  { %v3055_v3 = vpop.f32.mrb[22].mxu0 }
0x1418   :  { %v1974_v61 = vpop.f32.mrb[23].mxu0 }
0x1419   :  { %1989 = vrot.lane.b32.xlu1 %v3052_v11, %s3503_s1  ;;  %1991 = vrot.lane.b32.xlu0 %v1974_v61, %s3503_s1 }
0x141d   :  { %1993 = vrot.lane.b32.xlu1 %v3055_v3, %s3503_s1 }
0x1487   :  { %v1988_v17 = vpop.permute.xlu1 %1987 }
0x1488   :  { %v1999_v20 = vsel %vm269_vm1, %v4027_v47, %v1988_v17  ;;  %v2693_v47 = vld [vmem:[%s4195_s9 + $0x1] ss:$0 sm:$0xff]  ;;  %v2698_v17 = vld [vmem:[%s4197_s10 + $0x2] sm:$0x3] }
0x1489   :  { %3064 = vmatprep.mubr.msk.f32.mxu0 %vm67_vm0, %v1999_v20 }
0x148b   :  { %v1990_v21 = vpop.permute.xlu1 %1989  ;;  %v1992_v51 = vpop.permute.xlu0 %1991 }
0x148c   :  { %v2000_v15 = vsel %vm269_vm1, %v4025_v2, %v1990_v21  ;;  %v2001_v54 = vsel %vm269_vm1, %v4031_v50, %v1992_v51  ;;  %v2174_v21 = vrot.slane %v2698_v17, %v3834_v58 }
0x148d   :  { %3065 = vmatmul.mubr.msk.f32.vlgmr.msra.gmra.mrb[24].mxu0 %vm67_vm0, %v2000_v15 }
0x148e   :  { %3067 = vmatprep.mubr.msk.f32.mxu0 %vm67_vm0, %v2001_v54 }
0x148f   :  { %v1994_v22 = vpop.permute.xlu1 %1993 }
0x1490   :  { %v2002_v24 = vsel %vm269_vm1, %v4029_v4, %v1994_v22 }
0x1491   :  { %3068 = vmatmul.mubr.msk.f32.gmra.mrb[26].mxu0 %vm67_vm0, %v2002_v24  ;;  %v2182_v24 = vrot.slane %v2698_v17, %v3839_v32 }
0x1560   :  { %v3066_v26 = vpop.f32.mrb[24].mxu0 }
0x1561   :  { %v2100_v7 = vadd.f32 %v3066_v26, %v2693_v47  ;;  %v2094_v2 = vpop.f32.mrb[25].mxu0 }
0x1562   :  { %v2095_v27 = vadd.f32 %v2693_v47, %v2094_v2 }
0x1563   :  { %v2116_v50 = vadd.f32 %v2100_v7, %v3924_v18 }
0x1564   :  { %v3069_v9 = vpop.f32.mrb[26].mxu0  ;;  %v2115_v6 = vadd.f32 %v2095_v27, %v3922_v16 }
0x1565   :  { %v2104_v33 = vpop.f32.mrb[27].mxu0  ;;  %v2122_v60 = vsel %vm67_vm0, %v2116_v50, 0.0  ;;  %v2110_v30 = vadd.f32 %v3069_v9, %v2693_v47 }
0x1566   :  { %v2105_v4 = vadd.f32 %v2693_v47, %v2104_v33  ;;  %2123 = vadd.xlane.f32.xlu1 %v2122_v60  ;;  %v2119_v31 = vsel %vm67_vm0, %v2115_v6, 0.0 }
0x1567   :  { %2120 = vadd.xlane.f32.xlu0 %v2119_v31  ;;  %v2118_v14 = vadd.f32 %v2110_v30, %v3932_v5  ;;  %v2709_v31 = vld [vmem:[%s4198_s13 + $0x40] sm:$0xff] }
0x1568   :  { %v2117_v34 = vadd.f32 %v2105_v4, %v3930_v25 }
0x1569   :  { %v2128_v18 = vsel %vm67_vm0, %v2118_v14, 0.0 }
0x156a   :  { %v2125_v35 = vsel %vm67_vm0, %v2117_v34, 0.0 }
0x156b   :  { %2126 = vadd.xlane.f32.xlu0 %v2125_v35 }
0x156f   :  { %2129 = vadd.xlane.f32.xlu0 %v2128_v18  ;;  %v2712_v18 = vld [vmem:[%s4198_s13 + $0x58] sm:$0xff] }
0x15f3   :  { %v2124_v16 = vpop.xlane.xlu1 %2123 }
0x15f4   :  { %v2132_v36 = vmul.f32 0.03125, %v2124_v16  ;;  %v2121_v12 = vpop.xlane.xlu0 %2120 }
0x15f5   :  { %v2131_v49 = vmul.f32 0.03125, %v2121_v12  ;;  %v2714_v12 = vld [vmem:[%s4198_s13 + $0x68] sm:$0xff] }
0x15f6   :  { %v2136_v29 = vsub.f32 %v2116_v50, %v2132_v36  ;;  %v2713_v36 = vld [vmem:[%s4198_s13 + $0x60] sm:$0xff] }
0x15f7   :  { %v2135_v37 = vsub.f32 %v2115_v6, %v2131_v49  ;;  %v3269_v49 = vpack.c.bf16 %v2714_v12, %v2713_v36 }
0x15f8   :  { %v2127_v39 = vpop.xlane.xlu0 %2126  ;;  %v2140_v41 = vmul.f32 %v2136_v29, %v2136_v29 }
0x15f9   :  { %v2133_v42 = vmul.f32 0.03125, %v2127_v39  ;;  %v2139_v43 = vmul.f32 %v2135_v37, %v2135_v37 }
0x15fa   :  { %v2146_v25 = vsel %vm67_vm0, %v2140_v41, 0.0  ;;  %v2704_v41 = vld [vmem:[%s4199_s12 + $0x1] ss:$0 sm:$0xff] }
0x15fb   :  { %v2137_v44 = vsub.f32 %v2117_v34, %v2133_v42  ;;  %2147 = vadd.xlane.f32.xlu1 %v2146_v25  ;;  %v2143_v5 = vsel %vm67_vm0, %v2139_v43, 0.0  ;;  %v2710_v34 = vld [vmem:[%s4198_s13 + $0x48] sm:$0xff] }
0x15fc   :  { %2144 = vadd.xlane.f32.xlu0 %v2143_v5  ;;  %v2130_v45 = vpop.xlane.xlu0 %2129  ;;  %v3261_v35 = vpack.c.bf16 %v2710_v34, %v2709_v31 }
0x15fd   :  { %v2134_v46 = vmul.f32 0.03125, %v2130_v45  ;;  %v2141_v52 = vmul.f32 %v2137_v44, %v2137_v44 }
0x15fe   :  { %3262 = vmatprep.subr.bf16.mxu0 %v3261_v35 }
0x15ff   :  { %v2138_v53 = vsub.f32 %v2118_v14, %v2134_v46  ;;  %v2149_v55 = vsel %vm67_vm0, %v2141_v52, 0.0  ;;  %3264 = vmatpush3.bf16.msra.mxu0 %v3261_v35  ;;  %v2711_v14 = vld [vmem:[%s4198_s13 + $0x50] sm:$0xff] }
0x1600   :  { %2150 = vadd.xlane.f32.xlu0 %v2149_v55  ;;  %v3265_v16 = vpack.c.bf16 %v2712_v18, %v2711_v14 }
0x1601   :  { %v2142_v56 = vmul.f32 %v2138_v53, %v2138_v53 }
0x1602   :  { %3266 = vmatprep.subr.bf16.mxu0 %v3265_v16 }
0x1603   :  { %v2152_v19 = vsel %vm67_vm0, %v2142_v56, 0.0  ;;  %3268 = vmatpush3.bf16.msra.mxu0 %v3265_v16 }
0x1604   :  { %2153 = vadd.xlane.f32.xlu1 %v2152_v19  ;;  %3270 = vmatprep.subr.bf16.mxu0 %v3269_v49 }
0x1607   :  { %3272 = vmatpush3.bf16.msra.mxu0 %v3269_v49 }
0x1688   :  { %v2148_v48 = vpop.xlane.xlu1 %2147 }
0x1689   :  { %v2156_v1 = vmul.f32 0.03125, %v2148_v48  ;;  %v2145_v23 = vpop.xlane.xlu0 %2144 }
0x168a   :  { %v2155_v8 = vmul.f32 0.03125, %v2145_v23 }
0x168b   :  { %v2160_v40 = vadd.f32 1e-05, %v2156_v1 }
0x168c   :  { %v2159_v38 = vadd.f32 1e-05, %v2155_v8 }
0x168d   :  { %3468 = vrsqrt.f32 %v2160_v40  ;;  %v2151_v10 = vpop.xlane.xlu0 %2150 }
0x168e   :  { %3470 = vrsqrt.f32 %v2159_v38  ;;  %v2157_v11 = vmul.f32 0.03125, %v2151_v10 }
0x1690   :  { %v2161_v13 = vadd.f32 1e-05, %v2157_v11 }
0x1691   :  { %v2154_v3 = vpop.xlane.xlu1 %2153 }
0x1692   :  { %3472 = vrsqrt.f32 %v2161_v13  ;;  %v2158_v61 = vmul.f32 0.03125, %v2154_v3 }
0x1694   :  { %v2162_v20 = vadd.f32 1e-05, %v2158_v61 }
0x1696   :  { %3474 = vrsqrt.f32 %v2162_v20 }
0x1697   :  { %v3469_v51 = vpop.eup %3468 }
0x1698   :  { %v3471_v15 = vpop.eup %3470  ;;  %v2168_v54 = vmul.f32 %v3469_v51, %v2136_v29  ;;  %v2715_v29 = vld [vmem:[%s4198_s13 + $0x70] sm:$0xff] }
0x1699   :  { %v2167_v22 = vmul.f32 %v3471_v15, %v2135_v37  ;;  %v2716_v37 = vld [vmem:[%s4198_s13 + $0x78] sm:$0xff] }
0x169a   :  { %v2176_v47 = vmul.f32 %v2174_v21, %v2168_v54  ;;  %v3273_v39 = vpack.c.bf16 %v2716_v37, %v2715_v29 }
0x169b   :  { %v2175_v26 = vmul.f32 %v2174_v21, %v2167_v22 }
0x169c   :  { %v3473_v7 = vpop.eup %3472  ;;  %v4115_v50 = vadd.f32 %v2182_v24, %v2176_v47  ;;  %3274 = vmatprep.subr.bf16.mxu0 %v3273_v39 }
0x169d   :  { %v4113_v2 = vadd.f32 %v2182_v24, %v2175_v26  ;;  %v2169_v27 = vmul.f32 %v3473_v7, %v2137_v44  ;;  %3276 = vmatpush3.bf16.msra.mxu0 %v3273_v39 }
0x169f   :  { %3078 = vmatprep.mubr.msk.f32.mxu1 %vm67_vm0, %v4113_v2  ;;  %v2177_v9 = vmul.f32 %v2174_v21, %v2169_v27 }
0x16a0   :  { %v3475_v6 = vpop.eup %3474  ;;  %3079 = vmatmul.mubr.msk.f32.vlgmr.msra.gmra.mrb[28].mxu1 %vm67_vm0, %v4115_v50 }
0x16a1   :  { %v4121_v33 = vadd.f32 %v2182_v24, %v2177_v9  ;;  %v2170_v60 = vmul.f32 %v3475_v6, %v2138_v53 }
0x16a3   :  { %3081 = vmatprep.mubr.msk.f32.mxu1 %vm67_vm0, %v4121_v33  ;;  %v2178_v30 = vmul.f32 %v2174_v21, %v2170_v60 }
0x16a5   :  { %v4125_v4 = vadd.f32 %v2182_v24, %v2178_v30  ;;  %v2718_v30 = vld [vmem:[%s4200_s14 + $0x1] ss:$0 sm:$0xff] }
0x16a7   :  { %3082 = vmatmul.mubr.msk.f32.gmra.mrb[30].mxu1 %vm67_vm0, %v4125_v4 }
0x1773   :  { %v3080_v42 = vpop.f32.mrb[28].mxu1 }
0x1774   :  { %v2284_v43 = vadd.f32 %v3080_v42, %v2704_v41  ;;  %v2278_v25 = vpop.f32.mrb[29].mxu1 }
0x1775   :  { %v2279_v44 = vadd.f32 %v2704_v41, %v2278_v25 }
0x1776   :  { %v2298_v5 = vmul.f32 %v2284_v43, %v2284_v43 }
0x1777   :  { %v2297_v45 = vmul.f32 %v2279_v44, %v2279_v44 }
0x1778   :  { %v2302_v46 = vmul.f32 %v2298_v5, %v2284_v43 }
0x1779   :  { %v2301_v52 = vmul.f32 %v2297_v45, %v2279_v44 }
0x177a   :  { %v2306_v53 = vmul.f32 0.044715, %v2302_v46  ;;  %v3083_v55 = vpop.f32.mrb[30].mxu1 }
0x177b   :  { %v2305_v56 = vmul.f32 0.044715, %v2301_v52  ;;  %v2294_v19 = vadd.f32 %v3083_v55, %v2704_v41  ;;  %v2288_v28 = vpop.f32.mrb[31].mxu1 }
0x177c   :  { %v2310_v57 = vadd.f32 %v2306_v53, %v2284_v43  ;;  %v2289_v59 = vadd.f32 %v2704_v41, %v2288_v28 }
0x177d   :  { %v2309_v62 = vadd.f32 %v2305_v56, %v2279_v44  ;;  %v2300_v63 = vmul.f32 %v2294_v19, %v2294_v19 }
0x177e   :  { %v2314_v0 = vmul.f32 0.7978846, %v2310_v57  ;;  %v2299_v48 = vmul.f32 %v2289_v59, %v2289_v59 }
0x177f   :  { %v2313_v1 = vmul.f32 0.7978846, %v2309_v62  ;;  %v2304_v23 = vmul.f32 %v2300_v63, %v2294_v19 }
0x1780   :  { %3476 = vtanh.f32 %v2314_v0  ;;  %v2303_v8 = vmul.f32 %v2299_v48, %v2289_v59 }
0x1781   :  { %3478 = vtanh.f32 %v2313_v1  ;;  %v2308_v40 = vmul.f32 0.044715, %v2304_v23  ;;  %v3504_v1 = vmov 0.0|0.0   ;;  %v3506_v23 = vmov 0.0  }
0x1782   :  { %v2307_v38 = vmul.f32 0.044715, %v2303_v8  ;;  %3277 = vmatprep.subr.bf16.mxu1 %v3504_v1  ;;  %3114 = vmatprep.mubr.msk.f32.mxu1 %vm3505_vm4, %v3506_v23 }
0x1783   :  { %v2312_v10 = vadd.f32 %v2308_v40, %v2294_v19 }
0x1784   :  { %v2311_v11 = vadd.f32 %v2307_v38, %v2289_v59 }
0x1785   :  { %v2316_v13 = vmul.f32 0.7978846, %v2312_v10 }
0x1786   :  { %v2315_v3 = vmul.f32 0.7978846, %v2311_v11 }
0x1787   :  { %3480 = vtanh.f32 %v2316_v13 }
0x1788   :  { %3482 = vtanh.f32 %v2315_v3 }
0x178a   :  { %v3477_v61 = vpop.eup %3476 }
0x178b   :  { %v3479_v17 = vpop.eup %3478  ;;  %v2322_v20 = vadd.f32 1.0, %v3477_v61 }
0x178c   :  { %v2321_v21 = vadd.f32 1.0, %v3479_v17 }
0x178d   :  { %v2326_v51 = vmul.f32 0.5, %v2322_v20 }
0x178e   :  { %v2325_v15 = vmul.f32 0.5, %v2321_v21 }
0x178f   :  { %v2330_v24 = vmul.f32 %v2326_v51, %v2284_v43 }
0x1790   :  { %v2329_v54 = vmul.f32 %v2325_v15, %v2279_v44  ;;  %v2723_v15 = vld [vmem:[%s4201_s15 + $0x2] sm:$0x3] }
0x1791   :  { %v3481_v22 = vpop.eup %3480 }
0x1792   :  { %v3483_v47 = vpop.eup %3482  ;;  %3100 = vmatprep.mubr.msk.f32.mxu0 %vm1158_vm3, %v2329_v54  ;;  %v2324_v26 = vadd.f32 1.0, %v3481_v22  ;;  %v2508_v54 = vrot.slane %v2723_v15, %v3834_v58 }
0x1793   :  { %3101 = vmatmul.mubr.msk.f32.vlgmr.msra.gmra.mrb[28].mxu0 %vm1158_vm3, %v2330_v24  ;;  %v2323_v7 = vadd.f32 1.0, %v3483_v47 }
0x1794   :  { %v2328_v27 = vmul.f32 0.5, %v2324_v26  ;;  %v2516_v26 = vrot.slane %v2723_v15, %v3839_v32  ;;  %v2521_v32 = vld [vmem:[%s4202_s3] sm:$0xf] }
0x1795   :  { %v2327_v9 = vmul.f32 0.5, %v2323_v7 }
0x1796   :  { %v2332_v60 = vmul.f32 %v2328_v27, %v2294_v19 }
0x1797   :  { %v2331_v6 = vmul.f32 %v2327_v9, %v2289_v59 }
0x1799   :  { %3103 = vmatprep.mubr.msk.f32.mxu0 %vm1158_vm3, %v2331_v6 }
0x179a   :  { %3104 = vmatmul.mubr.msk.f32.gmra.mrb[30].mxu0 %vm1158_vm3, %v2332_v60 }
0x1866   :  { %v3102_v31 = vpop.f32.mrb[28].mxu0 }
0x1867   :  { %v2434_v34 = vadd.f32 %v3102_v31, %v2718_v30  ;;  %v2428_v35 = vpop.f32.mrb[29].mxu0 }
0x1868   :  { %v2429_v14 = vadd.f32 %v2718_v30, %v2428_v35 }
0x1869   :  { %v2450_v18 = vadd.f32 %v2434_v34, %v4115_v50 }
0x186a   :  { %v2449_v16 = vadd.f32 %v2429_v14, %v4113_v2 }
0x186b   :  { %v2456_v36 = vsel %vm67_vm0, %v2450_v18, 0.0 }
0x186c   :  { %2457 = vadd.xlane.f32.xlu1 %v2456_v36  ;;  %v2453_v12 = vsel %vm67_vm0, %v2449_v16, 0.0 }
0x186d   :  { %2454 = vadd.xlane.f32.xlu0 %v2453_v12  ;;  %v3105_v49 = vpop.f32.mrb[30].mxu0 }
0x186e   :  { %v2444_v29 = vadd.f32 %v3105_v49, %v2718_v30  ;;  %v2438_v37 = vpop.f32.mrb[31].mxu0 }
0x186f   :  { %v2439_v39 = vadd.f32 %v2718_v30, %v2438_v37 }
0x1870   :  { %v2452_v41 = vadd.f32 %v2444_v29, %v4125_v4 }
0x1871   :  { %v2451_v42 = vadd.f32 %v2439_v39, %v4121_v33 }
0x1872   :  { %v2462_v43 = vsel %vm67_vm0, %v2452_v41, 0.0 }
0x1873   :  { %2463 = vadd.xlane.f32.xlu1 %v2462_v43  ;;  %v2459_v50 = vsel %vm67_vm0, %v2451_v42, 0.0 }
0x1874   :  { %2460 = vadd.xlane.f32.xlu0 %v2459_v50 }
0x18f9   :  { %v2458_v2 = vpop.xlane.xlu1 %2457 }
0x18fa   :  { %v2466_v25 = vmul.f32 0.03125, %v2458_v2  ;;  %v2455_v44 = vpop.xlane.xlu0 %2454 }
0x18fb   :  { %v2465_v5 = vmul.f32 0.03125, %v2455_v44 }
0x18fc   :  { %v2470_v45 = vsub.f32 %v2450_v18, %v2466_v25 }
0x18fd   :  { %v2469_v46 = vsub.f32 %v2449_v16, %v2465_v5 }
0x18fe   :  { %v2474_v52 = vmul.f32 %v2470_v45, %v2470_v45 }
0x18ff   :  { %v2473_v53 = vmul.f32 %v2469_v46, %v2469_v46 }
0x1900   :  { %v2464_v55 = vpop.xlane.xlu1 %2463  ;;  %v2480_v56 = vsel %vm67_vm0, %v2474_v52, 0.0 }
0x1901   :  { %v2468_v4 = vmul.f32 0.03125, %v2464_v55  ;;  %2481 = vadd.xlane.f32.xlu1 %v2480_v56  ;;  %v2461_v33 = vpop.xlane.xlu0 %2460  ;;  %v2477_v19 = vsel %vm67_vm0, %v2473_v53, 0.0 }
0x1902   :  { %v2467_v28 = vmul.f32 0.03125, %v2461_v33  ;;  %2478 = vadd.xlane.f32.xlu0 %v2477_v19 }
0x1903   :  { %v2472_v57 = vsub.f32 %v2452_v41, %v2468_v4 }
0x1904   :  { %v2471_v59 = vsub.f32 %v2451_v42, %v2467_v28 }
0x1905   :  { %v2476_v62 = vmul.f32 %v2472_v57, %v2472_v57 }
0x1906   :  { %v2475_v63 = vmul.f32 %v2471_v59, %v2471_v59 }
0x1907   :  { %v2486_v0 = vsel %vm67_vm0, %v2476_v62, 0.0 }
0x1908   :  { %2487 = vadd.xlane.f32.xlu1 %v2486_v0  ;;  %v2483_v48 = vsel %vm67_vm0, %v2475_v63, 0.0 }
0x1909   :  { %2484 = vadd.xlane.f32.xlu0 %v2483_v48 }
0x198e   :  { %v2482_v8 = vpop.xlane.xlu1 %2481 }
0x198f   :  { %v2490_v40 = vmul.f32 0.03125, %v2482_v8  ;;  %v2479_v38 = vpop.xlane.xlu0 %2478 }
0x1990   :  { %v2489_v10 = vmul.f32 0.03125, %v2479_v38 }
0x1991   :  { %v2494_v11 = vadd.f32 1e-05, %v2490_v40 }
0x1992   :  { %v2493_v13 = vadd.f32 1e-05, %v2489_v10 }
0x1993   :  { %3484 = vrsqrt.f32 %v2494_v11 }
0x1994   :  { %3486 = vrsqrt.f32 %v2493_v13 }
0x1995   :  { %v2488_v3 = vpop.xlane.xlu1 %2487 }
0x1996   :  { %v2492_v61 = vmul.f32 0.03125, %v2488_v3  ;;  %v2485_v17 = vpop.xlane.xlu0 %2484 }
0x1997   :  { %v2491_v20 = vmul.f32 0.03125, %v2485_v17 }
0x1998   :  { %v2496_v21 = vadd.f32 1e-05, %v2492_v61 }
0x1999   :  { %v2495_v51 = vadd.f32 1e-05, %v2491_v20 }
0x199a   :  { %3488 = vrsqrt.f32 %v2496_v21 }
0x199b   :  { %3490 = vrsqrt.f32 %v2495_v51 }
0x199d   :  { %v3485_v22 = vpop.eup %3484 }
0x199e   :  { %v3487_v24 = vpop.eup %3486  ;;  %v2502_v47 = vmul.f32 %v3485_v22, %v2470_v45 }
0x199f   :  { %v2501_v7 = vmul.f32 %v3487_v24, %v2469_v46 }
0x19a0   :  { %v2510_v27 = vmul.f32 %v2508_v54, %v2502_v47 }
0x19a1   :  { %v2509_v9 = vmul.f32 %v2508_v54, %v2501_v7 }
0x19a2   :  { %v2518_v6 = vadd.f32 %v2516_v26, %v2510_v27 }
0x19a3   :  { %v2517_v60 = vadd.f32 %v2516_v26, %v2509_v9 }
0x19a4   :  { %v3489_v30 = vpop.eup %3488 }
0x19a5   :  { %v3491_v31 = vpop.eup %3490  ;;  %v2504_v34 = vmul.f32 %v3489_v30, %v2472_v57  ;;  %v3278_v35 = vpack.c.bf16 %v2518_v6, %v2517_v60 }
0x19a6   :  { %v2503_v14 = vmul.f32 %v3491_v31, %v2471_v59 }
0x19a7   :  { %3279 = vmatpush3.bf16.msra.mxu1 %v3278_v35  ;;  %v2512_v18 = vmul.f32 %v2508_v54, %v2504_v34 }
0x19a8   :  { %3280 = vmatprep.subr.bf16.mxu1 %v3504_v1  ;;  %v2511_v16 = vmul.f32 %v2508_v54, %v2503_v14 }
0x19a9   :  { %v2520_v58 = vadd.f32 %v2516_v26, %v2512_v18 }
0x19aa   :  { %v2519_v36 = vadd.f32 %v2516_v26, %v2511_v16 }
0x19ac   :  { %v3281_v12 = vpack.c.bf16 %v2520_v58, %v2519_v36 }
0x19ae   :  { %3282 = vmatpush3.bf16.msra.mxu1 %v3281_v12 }
0x19b1   :  { %3115 = vmatmul.mubr.msk.f32.vlgmr.msra.gmra.mrb[32].mxu1 %vm67_vm0, %v2521_v32 }
0x1a84   :  { %v2591_v49 = vpop.f32.mrb[32].mxu1 }
0x1a85   :  { %v2595_v29 = vmul.f32 %v2591_v49, %v2591_v49  ;;  %v3116_v37 = vpop.f32.mrb[33].mxu1 }
0x1a87   :  { %v2597_v39 = vsel %vm2596_vm5, %v2595_v29, 0.0 }
0x1a88   :  { %2598 = vadd.xlane.f32.xlu0 %v2597_v39 }
0x1b15   :  { %v2599_v41 = vpop.xlane.xlu0 %2598 }
0x1b16   :  { %v2600_v42 = vmax.f32 %v2599_v41, 1e-24 }
0x1b18   :  { %3492 = vrsqrt.f32 %v2600_v42 }
0x1b22   :  { %v3493_v43 = vpop.eup %3492 }
0x1b23   :  { %v2602_v50 = vmul.f32 %v3493_v43, %v2591_v49 }
0x1b25   :  { %2603 = vst.msk [vmem:[%s4203_s16] sm:$0xf] %vm2596_vm5, %v2602_v50 }

</bundles_post_ra>
